<compile_context>
chip_gen: v7x
topology: tpu7x:2x2x1
jax: 0.10.0
libtpu: 0.0.40
codegen_flags: <defaults>
</compile_context>

<pallas_src>
import jax
import jax.numpy as jnp
from jax.experimental import pallas as pl
from jax.experimental.pallas import tpu as pltpu

DROPOUT_P = 0.0  # from Dropout(p=0.0) — forward pass is the identity


def _dma_copy_kernel(x_hbm_ref, o_hbm_ref, sem):
    # Dropout with p = 0.0: keep everything, scale = 1/(1-p) = 1.0 -> pure copy.
    # Implemented as one HBM->HBM DMA (no VMEM staging, no vld/vst work).
    # TODO(synk): a p > 0 training-mode dropout would need a VMEM path with
    # pltpu.prng_seed / pltpu.prng_random_bits masking; not required here.
    copy = pltpu.make_async_copy(x_hbm_ref, o_hbm_ref, sem)
    copy.start()
    copy.wait()


def _dropout_identity_pallas(x: jax.Array) -> jax.Array:
    """Identity (Dropout p=0.0) as a single HBM->HBM DMA Pallas kernel."""
    return pl.pallas_call(
        _dma_copy_kernel,
        out_shape=jax.ShapeDtypeStruct(x.shape, x.dtype),
        in_specs=[pl.BlockSpec(memory_space=pl.ANY)],
        out_specs=pl.BlockSpec(memory_space=pl.ANY),
        scratch_shapes=[pltpu.SemaphoreType.DMA],
    )(x)


def dropout_p0(x: jax.Array, use_kernel: bool = False) -> jax.Array:
    """Dropout(p=0.0) forward.

    By default the kernel is elided (identity returns x directly — zero HBM traffic,
    zero launch cost). Pass use_kernel=True to force the Pallas DMA-copy path.
    """
    if DROPOUT_P == 0.0 and not use_kernel:
        return x
    return _dropout_identity_pallas(x)


if __name__ == "__main__":
    key = jax.random.PRNGKey(0)
    # Same shape as the PyTorch module's input x129: [1, 14, 14, 2048] (~1.5 MiB)
    x129 = jax.random.normal(key, (1, 14, 14, 2048), dtype=jnp.float32)

    # Exercise the Pallas kernel path explicitly.
    x130 = dropout_p0(x129, use_kernel=True)
    jax.block_until_ready(x130)

    # Sanity check: Dropout(p=0.0) forward is the identity.
    assert x130.shape == x129.shape
    assert x130.dtype == x129.dtype
    assert bool(jnp.array_equal(x130, x129))

    # Also check the elided (recommended production) path.
    x130_fast = dropout_p0(x129)
    assert bool(jnp.array_equal(x130_fast, x129))

    print("KERNEL_OK")
</pallas_src>

<mosaic_0001>
module attributes {stable_mosaic.version = 11 : i64} {
  func.func @_dma_copy_kernel(%arg0: memref<1x14x14x2048xf32, #tpu.memory_space<any>>, %arg1: memref<1x14x14x2048xf32, #tpu.memory_space<any>>, %arg2: memref<!tpu.dma_semaphore, #tpu.memory_space<semaphore_mem>>) attributes {dimension_semantics = [], scalar_prefetch = 0 : i64, scratch_operands = 1 : i64, tpu.core_type = #tpu.core_type<tc>} {
    tpu.enqueue_dma source(%arg0 : memref<1x14x14x2048xf32, #tpu.memory_space<any>>) target(%arg1 : memref<1x14x14x2048xf32, #tpu.memory_space<any>>) target_semaphore(%arg2 : memref<!tpu.dma_semaphore, #tpu.memory_space<semaphore_mem>>)
    tpu.wait_dma2 semaphore(%arg2 : memref<!tpu.dma_semaphore, #tpu.memory_space<semaphore_mem>>) src(%arg0 : memref<1x14x14x2048xf32, #tpu.memory_space<any>>) dst(%arg1 : memref<1x14x14x2048xf32, #tpu.memory_space<any>>)
    return
  }
}

</mosaic_0001>

<bundles_post_ra>
// kernel: tpu_custom_call.1
= control target key start
LH: loop header
LB: loop body
LE: loop exit
PB: predicated region body
PF: predicated region fallthrough
CT: control target
= control target key end

     0   :  { %s3663_s0 = inlined_call_operand.vmem [shape: f32[1,14,14,2048], index: 0, kind: input, shape index: {}]   ;;  %s3664_s1 = inlined_call_operand.vmem [shape: f32[1,14,14,2048], index: 1, kind: output, shape index: {}]  }
   0x1   :  { %v38_v0 = vld [vmem:[%s3663_s0] sm:$0xff]  ;;  %v40_v1 = vld [vmem:[%s3663_s0 + $0x8] sm:$0xff]  ;;  %v42_v2 = vld [vmem:[%s3663_s0 + $0x10] sm:$0xff] }
   0x2   :  { %39 = vst [vmem:[%s3664_s1] sm:$0xff] %v38_v0  ;;  %41 = vst [vmem:[%s3664_s1 + $0x8] sm:$0xff] %v40_v1  ;;  %v44_v3 = vld [vmem:[%s3663_s0 + $0x18] sm:$0xff]  ;;  %v46_v4 = vld [vmem:[%s3663_s0 + $0x20] sm:$0xff] }
   0x3   :  { %43 = vst [vmem:[%s3664_s1 + $0x10] sm:$0xff] %v42_v2  ;;  %v48_v5 = vld [vmem:[%s3663_s0 + $0x28] sm:$0xff]  ;;  %45 = vst [vmem:[%s3664_s1 + $0x18] sm:$0xff] %v44_v3  ;;  %v50_v6 = vld [vmem:[%s3663_s0 + $0x30] sm:$0xff] }
   0x4   :  { %47 = vst [vmem:[%s3664_s1 + $0x20] sm:$0xff] %v46_v4  ;;  %49 = vst [vmem:[%s3664_s1 + $0x28] sm:$0xff] %v48_v5  ;;  %v52_v7 = vld [vmem:[%s3663_s0 + $0x38] sm:$0xff]  ;;  %v54_v8 = vld [vmem:[%s3663_s0 + $0x40] sm:$0xff] }
   0x5   :  { %51 = vst [vmem:[%s3664_s1 + $0x30] sm:$0xff] %v50_v6  ;;  %53 = vst [vmem:[%s3664_s1 + $0x38] sm:$0xff] %v52_v7  ;;  %v56_v9 = vld [vmem:[%s3663_s0 + $0x48] sm:$0xff]  ;;  %v58_v10 = vld [vmem:[%s3663_s0 + $0x50] sm:$0xff] }
   0x6   :  { %55 = vst [vmem:[%s3664_s1 + $0x40] sm:$0xff] %v54_v8  ;;  %v60_v11 = vld [vmem:[%s3663_s0 + $0x58] sm:$0xff]  ;;  %57 = vst [vmem:[%s3664_s1 + $0x48] sm:$0xff] %v56_v9  ;;  %v62_v12 = vld [vmem:[%s3663_s0 + $0x60] sm:$0xff] }
   0x7   :  { %59 = vst [vmem:[%s3664_s1 + $0x50] sm:$0xff] %v58_v10  ;;  %61 = vst [vmem:[%s3664_s1 + $0x58] sm:$0xff] %v60_v11  ;;  %v64_v13 = vld [vmem:[%s3663_s0 + $0x68] sm:$0xff]  ;;  %v66_v14 = vld [vmem:[%s3663_s0 + $0x70] sm:$0xff] }
   0x8   :  { %63 = vst [vmem:[%s3664_s1 + $0x60] sm:$0xff] %v62_v12  ;;  %65 = vst [vmem:[%s3664_s1 + $0x68] sm:$0xff] %v64_v13  ;;  %v68_v15 = vld [vmem:[%s3663_s0 + $0x78] sm:$0xff]  ;;  %v70_v16 = vld [vmem:[%s3663_s0 + $0x80] sm:$0xff] }
   0x9   :  { %67 = vst [vmem:[%s3664_s1 + $0x70] sm:$0xff] %v66_v14  ;;  %v72_v17 = vld [vmem:[%s3663_s0 + $0x88] sm:$0xff]  ;;  %69 = vst [vmem:[%s3664_s1 + $0x78] sm:$0xff] %v68_v15  ;;  %v74_v18 = vld [vmem:[%s3663_s0 + $0x90] sm:$0xff] }
   0xa   :  { %71 = vst [vmem:[%s3664_s1 + $0x80] sm:$0xff] %v70_v16  ;;  %73 = vst [vmem:[%s3664_s1 + $0x88] sm:$0xff] %v72_v17  ;;  %v76_v19 = vld [vmem:[%s3663_s0 + $0x98] sm:$0xff]  ;;  %v78_v20 = vld [vmem:[%s3663_s0 + $0xa0] sm:$0xff] }
   0xb   :  { %75 = vst [vmem:[%s3664_s1 + $0x90] sm:$0xff] %v74_v18  ;;  %77 = vst [vmem:[%s3664_s1 + $0x98] sm:$0xff] %v76_v19  ;;  %v80_v21 = vld [vmem:[%s3663_s0 + $0xa8] sm:$0xff]  ;;  %v82_v22 = vld [vmem:[%s3663_s0 + $0xb0] sm:$0xff] }
   0xc   :  { %79 = vst [vmem:[%s3664_s1 + $0xa0] sm:$0xff] %v78_v20  ;;  %v84_v23 = vld [vmem:[%s3663_s0 + $0xb8] sm:$0xff]  ;;  %81 = vst [vmem:[%s3664_s1 + $0xa8] sm:$0xff] %v80_v21  ;;  %v86_v24 = vld [vmem:[%s3663_s0 + $0xc0] sm:$0xff] }
   0xd   :  { %83 = vst [vmem:[%s3664_s1 + $0xb0] sm:$0xff] %v82_v22  ;;  %85 = vst [vmem:[%s3664_s1 + $0xb8] sm:$0xff] %v84_v23  ;;  %v88_v25 = vld [vmem:[%s3663_s0 + $0xc8] sm:$0xff]  ;;  %v90_v26 = vld [vmem:[%s3663_s0 + $0xd0] sm:$0xff] }
   0xe   :  { %87 = vst [vmem:[%s3664_s1 + $0xc0] sm:$0xff] %v86_v24  ;;  %89 = vst [vmem:[%s3664_s1 + $0xc8] sm:$0xff] %v88_v25  ;;  %v92_v27 = vld [vmem:[%s3663_s0 + $0xd8] sm:$0xff]  ;;  %v94_v28 = vld [vmem:[%s3663_s0 + $0xe0] sm:$0xff] }
   0xf   :  { %91 = vst [vmem:[%s3664_s1 + $0xd0] sm:$0xff] %v90_v26  ;;  %v96_v29 = vld [vmem:[%s3663_s0 + $0xe8] sm:$0xff]  ;;  %93 = vst [vmem:[%s3664_s1 + $0xd8] sm:$0xff] %v92_v27  ;;  %v98_v30 = vld [vmem:[%s3663_s0 + $0xf0] sm:$0xff] }
  0x10   :  { %95 = vst [vmem:[%s3664_s1 + $0xe0] sm:$0xff] %v94_v28  ;;  %97 = vst [vmem:[%s3664_s1 + $0xe8] sm:$0xff] %v96_v29  ;;  %v100_v31 = vld [vmem:[%s3663_s0 + $0xf8] sm:$0xff]  ;;  %v102_v32 = vld [vmem:[%s3663_s0 + $0x100] sm:$0xff] }
  0x11   :  { %99 = vst [vmem:[%s3664_s1 + $0xf0] sm:$0xff] %v98_v30  ;;  %101 = vst [vmem:[%s3664_s1 + $0xf8] sm:$0xff] %v100_v31  ;;  %v104_v33 = vld [vmem:[%s3663_s0 + $0x108] sm:$0xff]  ;;  %v106_v34 = vld [vmem:[%s3663_s0 + $0x110] sm:$0xff] }
  0x12   :  { %103 = vst [vmem:[%s3664_s1 + $0x100] sm:$0xff] %v102_v32  ;;  %v108_v35 = vld [vmem:[%s3663_s0 + $0x118] sm:$0xff]  ;;  %105 = vst [vmem:[%s3664_s1 + $0x108] sm:$0xff] %v104_v33  ;;  %v110_v36 = vld [vmem:[%s3663_s0 + $0x120] sm:$0xff] }
  0x13   :  { %107 = vst [vmem:[%s3664_s1 + $0x110] sm:$0xff] %v106_v34  ;;  %109 = vst [vmem:[%s3664_s1 + $0x118] sm:$0xff] %v108_v35  ;;  %v112_v37 = vld [vmem:[%s3663_s0 + $0x128] sm:$0xff]  ;;  %v114_v38 = vld [vmem:[%s3663_s0 + $0x130] sm:$0xff] }
  0x14   :  { %111 = vst [vmem:[%s3664_s1 + $0x120] sm:$0xff] %v110_v36  ;;  %113 = vst [vmem:[%s3664_s1 + $0x128] sm:$0xff] %v112_v37  ;;  %v116_v39 = vld [vmem:[%s3663_s0 + $0x138] sm:$0xff]  ;;  %v118_v40 = vld [vmem:[%s3663_s0 + $0x140] sm:$0xff] }
  0x15   :  { %115 = vst [vmem:[%s3664_s1 + $0x130] sm:$0xff] %v114_v38  ;;  %v120_v41 = vld [vmem:[%s3663_s0 + $0x148] sm:$0xff]  ;;  %117 = vst [vmem:[%s3664_s1 + $0x138] sm:$0xff] %v116_v39  ;;  %v122_v42 = vld [vmem:[%s3663_s0 + $0x150] sm:$0xff] }
  0x16   :  { %119 = vst [vmem:[%s3664_s1 + $0x140] sm:$0xff] %v118_v40  ;;  %121 = vst [vmem:[%s3664_s1 + $0x148] sm:$0xff] %v120_v41  ;;  %v124_v43 = vld [vmem:[%s3663_s0 + $0x158] sm:$0xff]  ;;  %v126_v44 = vld [vmem:[%s3663_s0 + $0x160] sm:$0xff] }
  0x17   :  { %123 = vst [vmem:[%s3664_s1 + $0x150] sm:$0xff] %v122_v42  ;;  %125 = vst [vmem:[%s3664_s1 + $0x158] sm:$0xff] %v124_v43  ;;  %v128_v45 = vld [vmem:[%s3663_s0 + $0x168] sm:$0xff]  ;;  %v130_v46 = vld [vmem:[%s3663_s0 + $0x170] sm:$0xff] }
  0x18   :  { %127 = vst [vmem:[%s3664_s1 + $0x160] sm:$0xff] %v126_v44  ;;  %v132_v47 = vld [vmem:[%s3663_s0 + $0x178] sm:$0xff]  ;;  %129 = vst [vmem:[%s3664_s1 + $0x168] sm:$0xff] %v128_v45  ;;  %v134_v48 = vld [vmem:[%s3663_s0 + $0x180] sm:$0xff] }
  0x19   :  { %131 = vst [vmem:[%s3664_s1 + $0x170] sm:$0xff] %v130_v46  ;;  %133 = vst [vmem:[%s3664_s1 + $0x178] sm:$0xff] %v132_v47  ;;  %v136_v49 = vld [vmem:[%s3663_s0 + $0x188] sm:$0xff]  ;;  %v138_v50 = vld [vmem:[%s3663_s0 + $0x190] sm:$0xff] }
  0x1a   :  { %135 = vst [vmem:[%s3664_s1 + $0x180] sm:$0xff] %v134_v48  ;;  %137 = vst [vmem:[%s3664_s1 + $0x188] sm:$0xff] %v136_v49  ;;  %v140_v51 = vld [vmem:[%s3663_s0 + $0x198] sm:$0xff]  ;;  %v142_v52 = vld [vmem:[%s3663_s0 + $0x1a0] sm:$0xff] }
  0x1b   :  { %139 = vst [vmem:[%s3664_s1 + $0x190] sm:$0xff] %v138_v50  ;;  %v144_v53 = vld [vmem:[%s3663_s0 + $0x1a8] sm:$0xff]  ;;  %141 = vst [vmem:[%s3664_s1 + $0x198] sm:$0xff] %v140_v51  ;;  %v146_v54 = vld [vmem:[%s3663_s0 + $0x1b0] sm:$0xff] }
  0x1c   :  { %143 = vst [vmem:[%s3664_s1 + $0x1a0] sm:$0xff] %v142_v52  ;;  %145 = vst [vmem:[%s3664_s1 + $0x1a8] sm:$0xff] %v144_v53  ;;  %v148_v55 = vld [vmem:[%s3663_s0 + $0x1b8] sm:$0xff]  ;;  %v150_v56 = vld [vmem:[%s3663_s0 + $0x1c0] sm:$0xff] }
  0x1d   :  { %147 = vst [vmem:[%s3664_s1 + $0x1b0] sm:$0xff] %v146_v54  ;;  %149 = vst [vmem:[%s3664_s1 + $0x1b8] sm:$0xff] %v148_v55  ;;  %v152_v57 = vld [vmem:[%s3663_s0 + $0x1c8] sm:$0xff]  ;;  %v154_v58 = vld [vmem:[%s3663_s0 + $0x1d0] sm:$0xff] }
  0x1e   :  { %151 = vst [vmem:[%s3664_s1 + $0x1c0] sm:$0xff] %v150_v56  ;;  %v156_v59 = vld [vmem:[%s3663_s0 + $0x1d8] sm:$0xff]  ;;  %153 = vst [vmem:[%s3664_s1 + $0x1c8] sm:$0xff] %v152_v57  ;;  %v158_v60 = vld [vmem:[%s3663_s0 + $0x1e0] sm:$0xff] }
  0x1f   :  { %155 = vst [vmem:[%s3664_s1 + $0x1d0] sm:$0xff] %v154_v58  ;;  %157 = vst [vmem:[%s3664_s1 + $0x1d8] sm:$0xff] %v156_v59  ;;  %v160_v61 = vld [vmem:[%s3663_s0 + $0x1e8] sm:$0xff]  ;;  %v162_v62 = vld [vmem:[%s3663_s0 + $0x1f0] sm:$0xff] }
  0x20   :  { %159 = vst [vmem:[%s3664_s1 + $0x1e0] sm:$0xff] %v158_v60  ;;  %161 = vst [vmem:[%s3664_s1 + $0x1e8] sm:$0xff] %v160_v61  ;;  %v164_v63 = vld [vmem:[%s3663_s0 + $0x1f8] sm:$0xff]  ;;  %v166_v0 = vld [vmem:[%s3663_s0 + $0x200] sm:$0xff] }
  0x21   :  { %163 = vst [vmem:[%s3664_s1 + $0x1f0] sm:$0xff] %v162_v62  ;;  %v168_v1 = vld [vmem:[%s3663_s0 + $0x208] sm:$0xff]  ;;  %165 = vst [vmem:[%s3664_s1 + $0x1f8] sm:$0xff] %v164_v63  ;;  %v170_v2 = vld [vmem:[%s3663_s0 + $0x210] sm:$0xff] }
  0x22   :  { %167 = vst [vmem:[%s3664_s1 + $0x200] sm:$0xff] %v166_v0  ;;  %169 = vst [vmem:[%s3664_s1 + $0x208] sm:$0xff] %v168_v1  ;;  %v172_v3 = vld [vmem:[%s3663_s0 + $0x218] sm:$0xff]  ;;  %v174_v4 = vld [vmem:[%s3663_s0 + $0x220] sm:$0xff] }
  0x23   :  { %171 = vst [vmem:[%s3664_s1 + $0x210] sm:$0xff] %v170_v2  ;;  %173 = vst [vmem:[%s3664_s1 + $0x218] sm:$0xff] %v172_v3  ;;  %v176_v5 = vld [vmem:[%s3663_s0 + $0x228] sm:$0xff]  ;;  %v178_v6 = vld [vmem:[%s3663_s0 + $0x230] sm:$0xff] }
  0x24   :  { %175 = vst [vmem:[%s3664_s1 + $0x220] sm:$0xff] %v174_v4  ;;  %v180_v7 = vld [vmem:[%s3663_s0 + $0x238] sm:$0xff]  ;;  %177 = vst [vmem:[%s3664_s1 + $0x228] sm:$0xff] %v176_v5  ;;  %v182_v8 = vld [vmem:[%s3663_s0 + $0x240] sm:$0xff] }
  0x25   :  { %179 = vst [vmem:[%s3664_s1 + $0x230] sm:$0xff] %v178_v6  ;;  %181 = vst [vmem:[%s3664_s1 + $0x238] sm:$0xff] %v180_v7  ;;  %v184_v9 = vld [vmem:[%s3663_s0 + $0x248] sm:$0xff]  ;;  %v186_v10 = vld [vmem:[%s3663_s0 + $0x250] sm:$0xff] }
  0x26   :  { %183 = vst [vmem:[%s3664_s1 + $0x240] sm:$0xff] %v182_v8  ;;  %185 = vst [vmem:[%s3664_s1 + $0x248] sm:$0xff] %v184_v9  ;;  %v188_v11 = vld [vmem:[%s3663_s0 + $0x258] sm:$0xff]  ;;  %v190_v12 = vld [vmem:[%s3663_s0 + $0x260] sm:$0xff] }
  0x27   :  { %187 = vst [vmem:[%s3664_s1 + $0x250] sm:$0xff] %v186_v10  ;;  %v192_v13 = vld [vmem:[%s3663_s0 + $0x268] sm:$0xff]  ;;  %189 = vst [vmem:[%s3664_s1 + $0x258] sm:$0xff] %v188_v11  ;;  %v194_v14 = vld [vmem:[%s3663_s0 + $0x270] sm:$0xff] }
  0x28   :  { %191 = vst [vmem:[%s3664_s1 + $0x260] sm:$0xff] %v190_v12  ;;  %193 = vst [vmem:[%s3664_s1 + $0x268] sm:$0xff] %v192_v13  ;;  %v196_v15 = vld [vmem:[%s3663_s0 + $0x278] sm:$0xff]  ;;  %v198_v16 = vld [vmem:[%s3663_s0 + $0x280] sm:$0xff] }
  0x29   :  { %195 = vst [vmem:[%s3664_s1 + $0x270] sm:$0xff] %v194_v14  ;;  %197 = vst [vmem:[%s3664_s1 + $0x278] sm:$0xff] %v196_v15  ;;  %v200_v17 = vld [vmem:[%s3663_s0 + $0x288] sm:$0xff]  ;;  %v202_v18 = vld [vmem:[%s3663_s0 + $0x290] sm:$0xff] }
  0x2a   :  { %199 = vst [vmem:[%s3664_s1 + $0x280] sm:$0xff] %v198_v16  ;;  %v204_v19 = vld [vmem:[%s3663_s0 + $0x298] sm:$0xff]  ;;  %201 = vst [vmem:[%s3664_s1 + $0x288] sm:$0xff] %v200_v17  ;;  %v206_v20 = vld [vmem:[%s3663_s0 + $0x2a0] sm:$0xff] }
  0x2b   :  { %203 = vst [vmem:[%s3664_s1 + $0x290] sm:$0xff] %v202_v18  ;;  %205 = vst [vmem:[%s3664_s1 + $0x298] sm:$0xff] %v204_v19  ;;  %v208_v21 = vld [vmem:[%s3663_s0 + $0x2a8] sm:$0xff]  ;;  %v210_v22 = vld [vmem:[%s3663_s0 + $0x2b0] sm:$0xff] }
  0x2c   :  { %207 = vst [vmem:[%s3664_s1 + $0x2a0] sm:$0xff] %v206_v20  ;;  %209 = vst [vmem:[%s3664_s1 + $0x2a8] sm:$0xff] %v208_v21  ;;  %v212_v23 = vld [vmem:[%s3663_s0 + $0x2b8] sm:$0xff]  ;;  %v214_v24 = vld [vmem:[%s3663_s0 + $0x2c0] sm:$0xff] }
  0x2d   :  { %211 = vst [vmem:[%s3664_s1 + $0x2b0] sm:$0xff] %v210_v22  ;;  %v216_v25 = vld [vmem:[%s3663_s0 + $0x2c8] sm:$0xff]  ;;  %213 = vst [vmem:[%s3664_s1 + $0x2b8] sm:$0xff] %v212_v23  ;;  %v218_v26 = vld [vmem:[%s3663_s0 + $0x2d0] sm:$0xff] }
  0x2e   :  { %215 = vst [vmem:[%s3664_s1 + $0x2c0] sm:$0xff] %v214_v24  ;;  %217 = vst [vmem:[%s3664_s1 + $0x2c8] sm:$0xff] %v216_v25  ;;  %v220_v27 = vld [vmem:[%s3663_s0 + $0x2d8] sm:$0xff]  ;;  %v222_v28 = vld [vmem:[%s3663_s0 + $0x2e0] sm:$0xff] }
  0x2f   :  { %219 = vst [vmem:[%s3664_s1 + $0x2d0] sm:$0xff] %v218_v26  ;;  %221 = vst [vmem:[%s3664_s1 + $0x2d8] sm:$0xff] %v220_v27  ;;  %v224_v29 = vld [vmem:[%s3663_s0 + $0x2e8] sm:$0xff]  ;;  %v226_v30 = vld [vmem:[%s3663_s0 + $0x2f0] sm:$0xff] }
  0x30   :  { %223 = vst [vmem:[%s3664_s1 + $0x2e0] sm:$0xff] %v222_v28  ;;  %v228_v31 = vld [vmem:[%s3663_s0 + $0x2f8] sm:$0xff]  ;;  %225 = vst [vmem:[%s3664_s1 + $0x2e8] sm:$0xff] %v224_v29  ;;  %v230_v32 = vld [vmem:[%s3663_s0 + $0x300] sm:$0xff] }
  0x31   :  { %227 = vst [vmem:[%s3664_s1 + $0x2f0] sm:$0xff] %v226_v30  ;;  %229 = vst [vmem:[%s3664_s1 + $0x2f8] sm:$0xff] %v228_v31  ;;  %v232_v33 = vld [vmem:[%s3663_s0 + $0x308] sm:$0xff]  ;;  %v234_v34 = vld [vmem:[%s3663_s0 + $0x310] sm:$0xff] }
  0x32   :  { %231 = vst [vmem:[%s3664_s1 + $0x300] sm:$0xff] %v230_v32  ;;  %233 = vst [vmem:[%s3664_s1 + $0x308] sm:$0xff] %v232_v33  ;;  %v236_v35 = vld [vmem:[%s3663_s0 + $0x318] sm:$0xff]  ;;  %v238_v36 = vld [vmem:[%s3663_s0 + $0x320] sm:$0xff] }
  0x33   :  { %235 = vst [vmem:[%s3664_s1 + $0x310] sm:$0xff] %v234_v34  ;;  %v240_v37 = vld [vmem:[%s3663_s0 + $0x328] sm:$0xff]  ;;  %237 = vst [vmem:[%s3664_s1 + $0x318] sm:$0xff] %v236_v35  ;;  %v242_v38 = vld [vmem:[%s3663_s0 + $0x330] sm:$0xff] }
  0x34   :  { %239 = vst [vmem:[%s3664_s1 + $0x320] sm:$0xff] %v238_v36  ;;  %241 = vst [vmem:[%s3664_s1 + $0x328] sm:$0xff] %v240_v37  ;;  %v244_v39 = vld [vmem:[%s3663_s0 + $0x338] sm:$0xff]  ;;  %v246_v40 = vld [vmem:[%s3663_s0 + $0x340] sm:$0xff] }
  0x35   :  { %243 = vst [vmem:[%s3664_s1 + $0x330] sm:$0xff] %v242_v38  ;;  %245 = vst [vmem:[%s3664_s1 + $0x338] sm:$0xff] %v244_v39  ;;  %v248_v41 = vld [vmem:[%s3663_s0 + $0x348] sm:$0xff]  ;;  %v250_v42 = vld [vmem:[%s3663_s0 + $0x350] sm:$0xff] }
  0x36   :  { %247 = vst [vmem:[%s3664_s1 + $0x340] sm:$0xff] %v246_v40  ;;  %v252_v43 = vld [vmem:[%s3663_s0 + $0x358] sm:$0xff]  ;;  %249 = vst [vmem:[%s3664_s1 + $0x348] sm:$0xff] %v248_v41  ;;  %v254_v44 = vld [vmem:[%s3663_s0 + $0x360] sm:$0xff] }
  0x37   :  { %251 = vst [vmem:[%s3664_s1 + $0x350] sm:$0xff] %v250_v42  ;;  %253 = vst [vmem:[%s3664_s1 + $0x358] sm:$0xff] %v252_v43  ;;  %v256_v45 = vld [vmem:[%s3663_s0 + $0x368] sm:$0xff]  ;;  %v258_v46 = vld [vmem:[%s3663_s0 + $0x370] sm:$0xff] }
  0x38   :  { %255 = vst [vmem:[%s3664_s1 + $0x360] sm:$0xff] %v254_v44  ;;  %257 = vst [vmem:[%s3664_s1 + $0x368] sm:$0xff] %v256_v45  ;;  %v260_v47 = vld [vmem:[%s3663_s0 + $0x378] sm:$0xff]  ;;  %v262_v48 = vld [vmem:[%s3663_s0 + $0x380] sm:$0xff] }
  0x39   :  { %259 = vst [vmem:[%s3664_s1 + $0x370] sm:$0xff] %v258_v46  ;;  %v264_v49 = vld [vmem:[%s3663_s0 + $0x388] sm:$0xff]  ;;  %261 = vst [vmem:[%s3664_s1 + $0x378] sm:$0xff] %v260_v47  ;;  %v266_v50 = vld [vmem:[%s3663_s0 + $0x390] sm:$0xff] }
  0x3a   :  { %263 = vst [vmem:[%s3664_s1 + $0x380] sm:$0xff] %v262_v48  ;;  %265 = vst [vmem:[%s3664_s1 + $0x388] sm:$0xff] %v264_v49  ;;  %v268_v51 = vld [vmem:[%s3663_s0 + $0x398] sm:$0xff]  ;;  %v270_v52 = vld [vmem:[%s3663_s0 + $0x3a0] sm:$0xff] }
  0x3b   :  { %267 = vst [vmem:[%s3664_s1 + $0x390] sm:$0xff] %v266_v50  ;;  %269 = vst [vmem:[%s3664_s1 + $0x398] sm:$0xff] %v268_v51  ;;  %v272_v53 = vld [vmem:[%s3663_s0 + $0x3a8] sm:$0xff]  ;;  %v274_v54 = vld [vmem:[%s3663_s0 + $0x3b0] sm:$0xff] }
  0x3c   :  { %271 = vst [vmem:[%s3664_s1 + $0x3a0] sm:$0xff] %v270_v52  ;;  %v276_v55 = vld [vmem:[%s3663_s0 + $0x3b8] sm:$0xff]  ;;  %273 = vst [vmem:[%s3664_s1 + $0x3a8] sm:$0xff] %v272_v53  ;;  %v278_v56 = vld [vmem:[%s3663_s0 + $0x3c0] sm:$0xff] }
  0x3d   :  { %275 = vst [vmem:[%s3664_s1 + $0x3b0] sm:$0xff] %v274_v54  ;;  %277 = vst [vmem:[%s3664_s1 + $0x3b8] sm:$0xff] %v276_v55  ;;  %v280_v57 = vld [vmem:[%s3663_s0 + $0x3c8] sm:$0xff]  ;;  %v282_v58 = vld [vmem:[%s3663_s0 + $0x3d0] sm:$0xff] }
  0x3e   :  { %279 = vst [vmem:[%s3664_s1 + $0x3c0] sm:$0xff] %v278_v56  ;;  %281 = vst [vmem:[%s3664_s1 + $0x3c8] sm:$0xff] %v280_v57  ;;  %v284_v59 = vld [vmem:[%s3663_s0 + $0x3d8] sm:$0xff]  ;;  %v286_v60 = vld [vmem:[%s3663_s0 + $0x3e0] sm:$0xff] }
  0x3f   :  { %283 = vst [vmem:[%s3664_s1 + $0x3d0] sm:$0xff] %v282_v58  ;;  %v288_v61 = vld [vmem:[%s3663_s0 + $0x3e8] sm:$0xff]  ;;  %285 = vst [vmem:[%s3664_s1 + $0x3d8] sm:$0xff] %v284_v59  ;;  %v290_v62 = vld [vmem:[%s3663_s0 + $0x3f0] sm:$0xff] }
  0x40   :  { %287 = vst [vmem:[%s3664_s1 + $0x3e0] sm:$0xff] %v286_v60  ;;  %289 = vst [vmem:[%s3664_s1 + $0x3e8] sm:$0xff] %v288_v61  ;;  %v292_v63 = vld [vmem:[%s3663_s0 + $0x3f8] sm:$0xff]  ;;  %v294_v0 = vld [vmem:[%s3663_s0 + $0x400] sm:$0xff] }
  0x41   :  { %291 = vst [vmem:[%s3664_s1 + $0x3f0] sm:$0xff] %v290_v62  ;;  %293 = vst [vmem:[%s3664_s1 + $0x3f8] sm:$0xff] %v292_v63  ;;  %v296_v1 = vld [vmem:[%s3663_s0 + $0x408] sm:$0xff]  ;;  %v298_v2 = vld [vmem:[%s3663_s0 + $0x410] sm:$0xff] }
  0x42   :  { %295 = vst [vmem:[%s3664_s1 + $0x400] sm:$0xff] %v294_v0  ;;  %v300_v3 = vld [vmem:[%s3663_s0 + $0x418] sm:$0xff]  ;;  %297 = vst [vmem:[%s3664_s1 + $0x408] sm:$0xff] %v296_v1  ;;  %v302_v4 = vld [vmem:[%s3663_s0 + $0x420] sm:$0xff] }
  0x43   :  { %299 = vst [vmem:[%s3664_s1 + $0x410] sm:$0xff] %v298_v2  ;;  %301 = vst [vmem:[%s3664_s1 + $0x418] sm:$0xff] %v300_v3  ;;  %v304_v5 = vld [vmem:[%s3663_s0 + $0x428] sm:$0xff]  ;;  %v306_v6 = vld [vmem:[%s3663_s0 + $0x430] sm:$0xff] }
  0x44   :  { %303 = vst [vmem:[%s3664_s1 + $0x420] sm:$0xff] %v302_v4  ;;  %305 = vst [vmem:[%s3664_s1 + $0x428] sm:$0xff] %v304_v5  ;;  %v308_v7 = vld [vmem:[%s3663_s0 + $0x438] sm:$0xff]  ;;  %v310_v8 = vld [vmem:[%s3663_s0 + $0x440] sm:$0xff] }
  0x45   :  { %307 = vst [vmem:[%s3664_s1 + $0x430] sm:$0xff] %v306_v6  ;;  %v312_v9 = vld [vmem:[%s3663_s0 + $0x448] sm:$0xff]  ;;  %309 = vst [vmem:[%s3664_s1 + $0x438] sm:$0xff] %v308_v7  ;;  %v314_v10 = vld [vmem:[%s3663_s0 + $0x450] sm:$0xff] }
  0x46   :  { %311 = vst [vmem:[%s3664_s1 + $0x440] sm:$0xff] %v310_v8  ;;  %313 = vst [vmem:[%s3664_s1 + $0x448] sm:$0xff] %v312_v9  ;;  %v316_v11 = vld [vmem:[%s3663_s0 + $0x458] sm:$0xff]  ;;  %v318_v12 = vld [vmem:[%s3663_s0 + $0x460] sm:$0xff] }
  0x47   :  { %315 = vst [vmem:[%s3664_s1 + $0x450] sm:$0xff] %v314_v10  ;;  %317 = vst [vmem:[%s3664_s1 + $0x458] sm:$0xff] %v316_v11  ;;  %v320_v13 = vld [vmem:[%s3663_s0 + $0x468] sm:$0xff]  ;;  %v322_v14 = vld [vmem:[%s3663_s0 + $0x470] sm:$0xff] }
  0x48   :  { %319 = vst [vmem:[%s3664_s1 + $0x460] sm:$0xff] %v318_v12  ;;  %v324_v15 = vld [vmem:[%s3663_s0 + $0x478] sm:$0xff]  ;;  %321 = vst [vmem:[%s3664_s1 + $0x468] sm:$0xff] %v320_v13  ;;  %v326_v16 = vld [vmem:[%s3663_s0 + $0x480] sm:$0xff] }
  0x49   :  { %323 = vst [vmem:[%s3664_s1 + $0x470] sm:$0xff] %v322_v14  ;;  %325 = vst [vmem:[%s3664_s1 + $0x478] sm:$0xff] %v324_v15  ;;  %v328_v17 = vld [vmem:[%s3663_s0 + $0x488] sm:$0xff]  ;;  %v330_v18 = vld [vmem:[%s3663_s0 + $0x490] sm:$0xff] }
  0x4a   :  { %327 = vst [vmem:[%s3664_s1 + $0x480] sm:$0xff] %v326_v16  ;;  %329 = vst [vmem:[%s3664_s1 + $0x488] sm:$0xff] %v328_v17  ;;  %v332_v19 = vld [vmem:[%s3663_s0 + $0x498] sm:$0xff]  ;;  %v334_v20 = vld [vmem:[%s3663_s0 + $0x4a0] sm:$0xff] }
  0x4b   :  { %331 = vst [vmem:[%s3664_s1 + $0x490] sm:$0xff] %v330_v18  ;;  %v336_v21 = vld [vmem:[%s3663_s0 + $0x4a8] sm:$0xff]  ;;  %333 = vst [vmem:[%s3664_s1 + $0x498] sm:$0xff] %v332_v19  ;;  %v338_v22 = vld [vmem:[%s3663_s0 + $0x4b0] sm:$0xff] }
  0x4c   :  { %335 = vst [vmem:[%s3664_s1 + $0x4a0] sm:$0xff] %v334_v20  ;;  %337 = vst [vmem:[%s3664_s1 + $0x4a8] sm:$0xff] %v336_v21  ;;  %v340_v23 = vld [vmem:[%s3663_s0 + $0x4b8] sm:$0xff]  ;;  %v342_v24 = vld [vmem:[%s3663_s0 + $0x4c0] sm:$0xff] }
  0x4d   :  { %339 = vst [vmem:[%s3664_s1 + $0x4b0] sm:$0xff] %v338_v22  ;;  %341 = vst [vmem:[%s3664_s1 + $0x4b8] sm:$0xff] %v340_v23  ;;  %v344_v25 = vld [vmem:[%s3663_s0 + $0x4c8] sm:$0xff]  ;;  %v346_v26 = vld [vmem:[%s3663_s0 + $0x4d0] sm:$0xff] }
  0x4e   :  { %343 = vst [vmem:[%s3664_s1 + $0x4c0] sm:$0xff] %v342_v24  ;;  %v348_v27 = vld [vmem:[%s3663_s0 + $0x4d8] sm:$0xff]  ;;  %345 = vst [vmem:[%s3664_s1 + $0x4c8] sm:$0xff] %v344_v25  ;;  %v350_v28 = vld [vmem:[%s3663_s0 + $0x4e0] sm:$0xff] }
  0x4f   :  { %347 = vst [vmem:[%s3664_s1 + $0x4d0] sm:$0xff] %v346_v26  ;;  %349 = vst [vmem:[%s3664_s1 + $0x4d8] sm:$0xff] %v348_v27  ;;  %v352_v29 = vld [vmem:[%s3663_s0 + $0x4e8] sm:$0xff]  ;;  %v354_v30 = vld [vmem:[%s3663_s0 + $0x4f0] sm:$0xff] }
  0x50   :  { %351 = vst [vmem:[%s3664_s1 + $0x4e0] sm:$0xff] %v350_v28  ;;  %353 = vst [vmem:[%s3664_s1 + $0x4e8] sm:$0xff] %v352_v29  ;;  %v356_v31 = vld [vmem:[%s3663_s0 + $0x4f8] sm:$0xff]  ;;  %v358_v32 = vld [vmem:[%s3663_s0 + $0x500] sm:$0xff] }
  0x51   :  { %355 = vst [vmem:[%s3664_s1 + $0x4f0] sm:$0xff] %v354_v30  ;;  %v360_v33 = vld [vmem:[%s3663_s0 + $0x508] sm:$0xff]  ;;  %357 = vst [vmem:[%s3664_s1 + $0x4f8] sm:$0xff] %v356_v31  ;;  %v362_v34 = vld [vmem:[%s3663_s0 + $0x510] sm:$0xff] }
  0x52   :  { %359 = vst [vmem:[%s3664_s1 + $0x500] sm:$0xff] %v358_v32  ;;  %361 = vst [vmem:[%s3664_s1 + $0x508] sm:$0xff] %v360_v33  ;;  %v364_v35 = vld [vmem:[%s3663_s0 + $0x518] sm:$0xff]  ;;  %v366_v36 = vld [vmem:[%s3663_s0 + $0x520] sm:$0xff] }
  0x53   :  { %363 = vst [vmem:[%s3664_s1 + $0x510] sm:$0xff] %v362_v34  ;;  %365 = vst [vmem:[%s3664_s1 + $0x518] sm:$0xff] %v364_v35  ;;  %v368_v37 = vld [vmem:[%s3663_s0 + $0x528] sm:$0xff]  ;;  %v370_v38 = vld [vmem:[%s3663_s0 + $0x530] sm:$0xff] }
  0x54   :  { %367 = vst [vmem:[%s3664_s1 + $0x520] sm:$0xff] %v366_v36  ;;  %v372_v39 = vld [vmem:[%s3663_s0 + $0x538] sm:$0xff]  ;;  %369 = vst [vmem:[%s3664_s1 + $0x528] sm:$0xff] %v368_v37  ;;  %v374_v40 = vld [vmem:[%s3663_s0 + $0x540] sm:$0xff] }
  0x55   :  { %371 = vst [vmem:[%s3664_s1 + $0x530] sm:$0xff] %v370_v38  ;;  %373 = vst [vmem:[%s3664_s1 + $0x538] sm:$0xff] %v372_v39  ;;  %v376_v41 = vld [vmem:[%s3663_s0 + $0x548] sm:$0xff]  ;;  %v378_v42 = vld [vmem:[%s3663_s0 + $0x550] sm:$0xff] }
  0x56   :  { %375 = vst [vmem:[%s3664_s1 + $0x540] sm:$0xff] %v374_v40  ;;  %377 = vst [vmem:[%s3664_s1 + $0x548] sm:$0xff] %v376_v41  ;;  %v380_v43 = vld [vmem:[%s3663_s0 + $0x558] sm:$0xff]  ;;  %v382_v44 = vld [vmem:[%s3663_s0 + $0x560] sm:$0xff] }
  0x57   :  { %379 = vst [vmem:[%s3664_s1 + $0x550] sm:$0xff] %v378_v42  ;;  %v384_v45 = vld [vmem:[%s3663_s0 + $0x568] sm:$0xff]  ;;  %381 = vst [vmem:[%s3664_s1 + $0x558] sm:$0xff] %v380_v43  ;;  %v386_v46 = vld [vmem:[%s3663_s0 + $0x570] sm:$0xff] }
  0x58   :  { %383 = vst [vmem:[%s3664_s1 + $0x560] sm:$0xff] %v382_v44  ;;  %385 = vst [vmem:[%s3664_s1 + $0x568] sm:$0xff] %v384_v45  ;;  %v388_v47 = vld [vmem:[%s3663_s0 + $0x578] sm:$0xff]  ;;  %v390_v48 = vld [vmem:[%s3663_s0 + $0x580] sm:$0xff] }
  0x59   :  { %387 = vst [vmem:[%s3664_s1 + $0x570] sm:$0xff] %v386_v46  ;;  %389 = vst [vmem:[%s3664_s1 + $0x578] sm:$0xff] %v388_v47  ;;  %v392_v49 = vld [vmem:[%s3663_s0 + $0x588] sm:$0xff]  ;;  %v394_v50 = vld [vmem:[%s3663_s0 + $0x590] sm:$0xff] }
  0x5a   :  { %391 = vst [vmem:[%s3664_s1 + $0x580] sm:$0xff] %v390_v48  ;;  %v396_v51 = vld [vmem:[%s3663_s0 + $0x598] sm:$0xff]  ;;  %393 = vst [vmem:[%s3664_s1 + $0x588] sm:$0xff] %v392_v49  ;;  %v398_v52 = vld [vmem:[%s3663_s0 + $0x5a0] sm:$0xff] }
  0x5b   :  { %395 = vst [vmem:[%s3664_s1 + $0x590] sm:$0xff] %v394_v50  ;;  %397 = vst [vmem:[%s3664_s1 + $0x598] sm:$0xff] %v396_v51  ;;  %v400_v53 = vld [vmem:[%s3663_s0 + $0x5a8] sm:$0xff]  ;;  %v402_v54 = vld [vmem:[%s3663_s0 + $0x5b0] sm:$0xff] }
  0x5c   :  { %399 = vst [vmem:[%s3664_s1 + $0x5a0] sm:$0xff] %v398_v52  ;;  %401 = vst [vmem:[%s3664_s1 + $0x5a8] sm:$0xff] %v400_v53  ;;  %v404_v55 = vld [vmem:[%s3663_s0 + $0x5b8] sm:$0xff]  ;;  %v406_v56 = vld [vmem:[%s3663_s0 + $0x5c0] sm:$0xff] }
  0x5d   :  { %403 = vst [vmem:[%s3664_s1 + $0x5b0] sm:$0xff] %v402_v54  ;;  %v408_v57 = vld [vmem:[%s3663_s0 + $0x5c8] sm:$0xff]  ;;  %405 = vst [vmem:[%s3664_s1 + $0x5b8] sm:$0xff] %v404_v55  ;;  %v410_v58 = vld [vmem:[%s3663_s0 + $0x5d0] sm:$0xff] }
  0x5e   :  { %407 = vst [vmem:[%s3664_s1 + $0x5c0] sm:$0xff] %v406_v56  ;;  %409 = vst [vmem:[%s3664_s1 + $0x5c8] sm:$0xff] %v408_v57  ;;  %v412_v59 = vld [vmem:[%s3663_s0 + $0x5d8] sm:$0xff]  ;;  %v414_v60 = vld [vmem:[%s3663_s0 + $0x5e0] sm:$0xff] }
  0x5f   :  { %411 = vst [vmem:[%s3664_s1 + $0x5d0] sm:$0xff] %v410_v58  ;;  %413 = vst [vmem:[%s3664_s1 + $0x5d8] sm:$0xff] %v412_v59  ;;  %v416_v61 = vld [vmem:[%s3663_s0 + $0x5e8] sm:$0xff]  ;;  %v418_v62 = vld [vmem:[%s3663_s0 + $0x5f0] sm:$0xff] }
  0x60   :  { %415 = vst [vmem:[%s3664_s1 + $0x5e0] sm:$0xff] %v414_v60  ;;  %v420_v63 = vld [vmem:[%s3663_s0 + $0x5f8] sm:$0xff]  ;;  %417 = vst [vmem:[%s3664_s1 + $0x5e8] sm:$0xff] %v416_v61  ;;  %v422_v0 = vld [vmem:[%s3663_s0 + $0x600] sm:$0xff] }
  0x61   :  { %419 = vst [vmem:[%s3664_s1 + $0x5f0] sm:$0xff] %v418_v62  ;;  %421 = vst [vmem:[%s3664_s1 + $0x5f8] sm:$0xff] %v420_v63  ;;  %v424_v1 = vld [vmem:[%s3663_s0 + $0x608] sm:$0xff]  ;;  %v426_v2 = vld [vmem:[%s3663_s0 + $0x610] sm:$0xff] }
  0x62   :  { %423 = vst [vmem:[%s3664_s1 + $0x600] sm:$0xff] %v422_v0  ;;  %425 = vst [vmem:[%s3664_s1 + $0x608] sm:$0xff] %v424_v1  ;;  %v428_v3 = vld [vmem:[%s3663_s0 + $0x618] sm:$0xff]  ;;  %v430_v4 = vld [vmem:[%s3663_s0 + $0x620] sm:$0xff] }
  0x63   :  { %427 = vst [vmem:[%s3664_s1 + $0x610] sm:$0xff] %v426_v2  ;;  %v432_v5 = vld [vmem:[%s3663_s0 + $0x628] sm:$0xff]  ;;  %429 = vst [vmem:[%s3664_s1 + $0x618] sm:$0xff] %v428_v3  ;;  %v434_v6 = vld [vmem:[%s3663_s0 + $0x630] sm:$0xff] }
  0x64   :  { %431 = vst [vmem:[%s3664_s1 + $0x620] sm:$0xff] %v430_v4  ;;  %433 = vst [vmem:[%s3664_s1 + $0x628] sm:$0xff] %v432_v5  ;;  %v436_v7 = vld [vmem:[%s3663_s0 + $0x638] sm:$0xff]  ;;  %v438_v8 = vld [vmem:[%s3663_s0 + $0x640] sm:$0xff] }
  0x65   :  { %435 = vst [vmem:[%s3664_s1 + $0x630] sm:$0xff] %v434_v6  ;;  %437 = vst [vmem:[%s3664_s1 + $0x638] sm:$0xff] %v436_v7  ;;  %v440_v9 = vld [vmem:[%s3663_s0 + $0x648] sm:$0xff]  ;;  %v442_v10 = vld [vmem:[%s3663_s0 + $0x650] sm:$0xff] }
  0x66   :  { %439 = vst [vmem:[%s3664_s1 + $0x640] sm:$0xff] %v438_v8  ;;  %v444_v11 = vld [vmem:[%s3663_s0 + $0x658] sm:$0xff]  ;;  %441 = vst [vmem:[%s3664_s1 + $0x648] sm:$0xff] %v440_v9  ;;  %v446_v12 = vld [vmem:[%s3663_s0 + $0x660] sm:$0xff] }
  0x67   :  { %443 = vst [vmem:[%s3664_s1 + $0x650] sm:$0xff] %v442_v10  ;;  %445 = vst [vmem:[%s3664_s1 + $0x658] sm:$0xff] %v444_v11  ;;  %v448_v13 = vld [vmem:[%s3663_s0 + $0x668] sm:$0xff]  ;;  %v450_v14 = vld [vmem:[%s3663_s0 + $0x670] sm:$0xff] }
  0x68   :  { %447 = vst [vmem:[%s3664_s1 + $0x660] sm:$0xff] %v446_v12  ;;  %449 = vst [vmem:[%s3664_s1 + $0x668] sm:$0xff] %v448_v13  ;;  %v452_v15 = vld [vmem:[%s3663_s0 + $0x678] sm:$0xff]  ;;  %v454_v16 = vld [vmem:[%s3663_s0 + $0x680] sm:$0xff] }
  0x69   :  { %451 = vst [vmem:[%s3664_s1 + $0x670] sm:$0xff] %v450_v14  ;;  %v456_v17 = vld [vmem:[%s3663_s0 + $0x688] sm:$0xff]  ;;  %453 = vst [vmem:[%s3664_s1 + $0x678] sm:$0xff] %v452_v15  ;;  %v458_v18 = vld [vmem:[%s3663_s0 + $0x690] sm:$0xff] }
  0x6a   :  { %455 = vst [vmem:[%s3664_s1 + $0x680] sm:$0xff] %v454_v16  ;;  %457 = vst [vmem:[%s3664_s1 + $0x688] sm:$0xff] %v456_v17  ;;  %v460_v19 = vld [vmem:[%s3663_s0 + $0x698] sm:$0xff]  ;;  %v462_v20 = vld [vmem:[%s3663_s0 + $0x6a0] sm:$0xff] }
  0x6b   :  { %459 = vst [vmem:[%s3664_s1 + $0x690] sm:$0xff] %v458_v18  ;;  %461 = vst [vmem:[%s3664_s1 + $0x698] sm:$0xff] %v460_v19  ;;  %v464_v21 = vld [vmem:[%s3663_s0 + $0x6a8] sm:$0xff]  ;;  %v466_v22 = vld [vmem:[%s3663_s0 + $0x6b0] sm:$0xff] }
  0x6c   :  { %463 = vst [vmem:[%s3664_s1 + $0x6a0] sm:$0xff] %v462_v20  ;;  %v468_v23 = vld [vmem:[%s3663_s0 + $0x6b8] sm:$0xff]  ;;  %465 = vst [vmem:[%s3664_s1 + $0x6a8] sm:$0xff] %v464_v21  ;;  %v470_v24 = vld [vmem:[%s3663_s0 + $0x6c0] sm:$0xff] }
  0x6d   :  { %467 = vst [vmem:[%s3664_s1 + $0x6b0] sm:$0xff] %v466_v22  ;;  %469 = vst [vmem:[%s3664_s1 + $0x6b8] sm:$0xff] %v468_v23  ;;  %v472_v25 = vld [vmem:[%s3663_s0 + $0x6c8] sm:$0xff]  ;;  %v474_v26 = vld [vmem:[%s3663_s0 + $0x6d0] sm:$0xff] }
  0x6e   :  { %471 = vst [vmem:[%s3664_s1 + $0x6c0] sm:$0xff] %v470_v24  ;;  %473 = vst [vmem:[%s3664_s1 + $0x6c8] sm:$0xff] %v472_v25  ;;  %v476_v27 = vld [vmem:[%s3663_s0 + $0x6d8] sm:$0xff]  ;;  %v478_v28 = vld [vmem:[%s3663_s0 + $0x6e0] sm:$0xff] }
  0x6f   :  { %475 = vst [vmem:[%s3664_s1 + $0x6d0] sm:$0xff] %v474_v26  ;;  %v480_v29 = vld [vmem:[%s3663_s0 + $0x6e8] sm:$0xff]  ;;  %477 = vst [vmem:[%s3664_s1 + $0x6d8] sm:$0xff] %v476_v27  ;;  %v482_v30 = vld [vmem:[%s3663_s0 + $0x6f0] sm:$0xff] }
  0x70   :  { %479 = vst [vmem:[%s3664_s1 + $0x6e0] sm:$0xff] %v478_v28  ;;  %481 = vst [vmem:[%s3664_s1 + $0x6e8] sm:$0xff] %v480_v29  ;;  %v484_v31 = vld [vmem:[%s3663_s0 + $0x6f8] sm:$0xff]  ;;  %v486_v32 = vld [vmem:[%s3663_s0 + $0x700] sm:$0xff] }
  0x71   :  { %483 = vst [vmem:[%s3664_s1 + $0x6f0] sm:$0xff] %v482_v30  ;;  %485 = vst [vmem:[%s3664_s1 + $0x6f8] sm:$0xff] %v484_v31  ;;  %v488_v33 = vld [vmem:[%s3663_s0 + $0x708] sm:$0xff]  ;;  %v490_v34 = vld [vmem:[%s3663_s0 + $0x710] sm:$0xff] }
  0x72   :  { %487 = vst [vmem:[%s3664_s1 + $0x700] sm:$0xff] %v486_v32  ;;  %v492_v35 = vld [vmem:[%s3663_s0 + $0x718] sm:$0xff]  ;;  %489 = vst [vmem:[%s3664_s1 + $0x708] sm:$0xff] %v488_v33  ;;  %v494_v36 = vld [vmem:[%s3663_s0 + $0x720] sm:$0xff] }
  0x73   :  { %491 = vst [vmem:[%s3664_s1 + $0x710] sm:$0xff] %v490_v34  ;;  %493 = vst [vmem:[%s3664_s1 + $0x718] sm:$0xff] %v492_v35  ;;  %v496_v37 = vld [vmem:[%s3663_s0 + $0x728] sm:$0xff]  ;;  %v498_v38 = vld [vmem:[%s3663_s0 + $0x730] sm:$0xff] }
  0x74   :  { %495 = vst [vmem:[%s3664_s1 + $0x720] sm:$0xff] %v494_v36  ;;  %497 = vst [vmem:[%s3664_s1 + $0x728] sm:$0xff] %v496_v37  ;;  %v500_v39 = vld [vmem:[%s3663_s0 + $0x738] sm:$0xff]  ;;  %v502_v40 = vld [vmem:[%s3663_s0 + $0x740] sm:$0xff] }
  0x75   :  { %499 = vst [vmem:[%s3664_s1 + $0x730] sm:$0xff] %v498_v38  ;;  %v504_v41 = vld [vmem:[%s3663_s0 + $0x748] sm:$0xff]  ;;  %501 = vst [vmem:[%s3664_s1 + $0x738] sm:$0xff] %v500_v39  ;;  %v506_v42 = vld [vmem:[%s3663_s0 + $0x750] sm:$0xff] }
  0x76   :  { %503 = vst [vmem:[%s3664_s1 + $0x740] sm:$0xff] %v502_v40  ;;  %505 = vst [vmem:[%s3664_s1 + $0x748] sm:$0xff] %v504_v41  ;;  %v508_v43 = vld [vmem:[%s3663_s0 + $0x758] sm:$0xff]  ;;  %v510_v44 = vld [vmem:[%s3663_s0 + $0x760] sm:$0xff] }
  0x77   :  { %507 = vst [vmem:[%s3664_s1 + $0x750] sm:$0xff] %v506_v42  ;;  %509 = vst [vmem:[%s3664_s1 + $0x758] sm:$0xff] %v508_v43  ;;  %v512_v45 = vld [vmem:[%s3663_s0 + $0x768] sm:$0xff]  ;;  %v514_v46 = vld [vmem:[%s3663_s0 + $0x770] sm:$0xff] }
  0x78   :  { %511 = vst [vmem:[%s3664_s1 + $0x760] sm:$0xff] %v510_v44  ;;  %v516_v47 = vld [vmem:[%s3663_s0 + $0x778] sm:$0xff]  ;;  %513 = vst [vmem:[%s3664_s1 + $0x768] sm:$0xff] %v512_v45  ;;  %v518_v48 = vld [vmem:[%s3663_s0 + $0x780] sm:$0xff] }
  0x79   :  { %515 = vst [vmem:[%s3664_s1 + $0x770] sm:$0xff] %v514_v46  ;;  %517 = vst [vmem:[%s3664_s1 + $0x778] sm:$0xff] %v516_v47  ;;  %v520_v49 = vld [vmem:[%s3663_s0 + $0x788] sm:$0xff]  ;;  %v522_v50 = vld [vmem:[%s3663_s0 + $0x790] sm:$0xff] }
  0x7a   :  { %519 = vst [vmem:[%s3664_s1 + $0x780] sm:$0xff] %v518_v48  ;;  %521 = vst [vmem:[%s3664_s1 + $0x788] sm:$0xff] %v520_v49  ;;  %v524_v51 = vld [vmem:[%s3663_s0 + $0x798] sm:$0xff]  ;;  %v526_v52 = vld [vmem:[%s3663_s0 + $0x7a0] sm:$0xff] }
  0x7b   :  { %523 = vst [vmem:[%s3664_s1 + $0x790] sm:$0xff] %v522_v50  ;;  %v528_v53 = vld [vmem:[%s3663_s0 + $0x7a8] sm:$0xff]  ;;  %525 = vst [vmem:[%s3664_s1 + $0x798] sm:$0xff] %v524_v51  ;;  %v530_v54 = vld [vmem:[%s3663_s0 + $0x7b0] sm:$0xff] }
  0x7c   :  { %527 = vst [vmem:[%s3664_s1 + $0x7a0] sm:$0xff] %v526_v52  ;;  %529 = vst [vmem:[%s3664_s1 + $0x7a8] sm:$0xff] %v528_v53  ;;  %v532_v55 = vld [vmem:[%s3663_s0 + $0x7b8] sm:$0xff]  ;;  %v534_v56 = vld [vmem:[%s3663_s0 + $0x7c0] sm:$0xff] }
  0x7d   :  { %531 = vst [vmem:[%s3664_s1 + $0x7b0] sm:$0xff] %v530_v54  ;;  %533 = vst [vmem:[%s3664_s1 + $0x7b8] sm:$0xff] %v532_v55  ;;  %v536_v57 = vld [vmem:[%s3663_s0 + $0x7c8] sm:$0xff]  ;;  %v538_v58 = vld [vmem:[%s3663_s0 + $0x7d0] sm:$0xff] }
  0x7e   :  { %535 = vst [vmem:[%s3664_s1 + $0x7c0] sm:$0xff] %v534_v56  ;;  %v540_v59 = vld [vmem:[%s3663_s0 + $0x7d8] sm:$0xff]  ;;  %537 = vst [vmem:[%s3664_s1 + $0x7c8] sm:$0xff] %v536_v57  ;;  %v542_v60 = vld [vmem:[%s3663_s0 + $0x7e0] sm:$0xff] }
  0x7f   :  { %539 = vst [vmem:[%s3664_s1 + $0x7d0] sm:$0xff] %v538_v58  ;;  %541 = vst [vmem:[%s3664_s1 + $0x7d8] sm:$0xff] %v540_v59  ;;  %v544_v61 = vld [vmem:[%s3663_s0 + $0x7e8] sm:$0xff]  ;;  %v546_v62 = vld [vmem:[%s3663_s0 + $0x7f0] sm:$0xff] }
  0x80   :  { %543 = vst [vmem:[%s3664_s1 + $0x7e0] sm:$0xff] %v542_v60  ;;  %545 = vst [vmem:[%s3664_s1 + $0x7e8] sm:$0xff] %v544_v61  ;;  %v548_v63 = vld [vmem:[%s3663_s0 + $0x7f8] sm:$0xff]  ;;  %v550_v0 = vld [vmem:[%s3663_s0 + $0x800] sm:$0xff] }
  0x81   :  { %547 = vst [vmem:[%s3664_s1 + $0x7f0] sm:$0xff] %v546_v62  ;;  %v552_v1 = vld [vmem:[%s3663_s0 + $0x808] sm:$0xff]  ;;  %549 = vst [vmem:[%s3664_s1 + $0x7f8] sm:$0xff] %v548_v63  ;;  %v554_v2 = vld [vmem:[%s3663_s0 + $0x810] sm:$0xff] }
  0x82   :  { %551 = vst [vmem:[%s3664_s1 + $0x800] sm:$0xff] %v550_v0  ;;  %553 = vst [vmem:[%s3664_s1 + $0x808] sm:$0xff] %v552_v1  ;;  %v556_v3 = vld [vmem:[%s3663_s0 + $0x818] sm:$0xff]  ;;  %v558_v4 = vld [vmem:[%s3663_s0 + $0x820] sm:$0xff] }
  0x83   :  { %555 = vst [vmem:[%s3664_s1 + $0x810] sm:$0xff] %v554_v2  ;;  %557 = vst [vmem:[%s3664_s1 + $0x818] sm:$0xff] %v556_v3  ;;  %v560_v5 = vld [vmem:[%s3663_s0 + $0x828] sm:$0xff]  ;;  %v562_v6 = vld [vmem:[%s3663_s0 + $0x830] sm:$0xff] }
  0x84   :  { %559 = vst [vmem:[%s3664_s1 + $0x820] sm:$0xff] %v558_v4  ;;  %v564_v7 = vld [vmem:[%s3663_s0 + $0x838] sm:$0xff]  ;;  %561 = vst [vmem:[%s3664_s1 + $0x828] sm:$0xff] %v560_v5  ;;  %v566_v8 = vld [vmem:[%s3663_s0 + $0x840] sm:$0xff] }
  0x85   :  { %563 = vst [vmem:[%s3664_s1 + $0x830] sm:$0xff] %v562_v6  ;;  %565 = vst [vmem:[%s3664_s1 + $0x838] sm:$0xff] %v564_v7  ;;  %v568_v9 = vld [vmem:[%s3663_s0 + $0x848] sm:$0xff]  ;;  %v570_v10 = vld [vmem:[%s3663_s0 + $0x850] sm:$0xff] }
  0x86   :  { %567 = vst [vmem:[%s3664_s1 + $0x840] sm:$0xff] %v566_v8  ;;  %569 = vst [vmem:[%s3664_s1 + $0x848] sm:$0xff] %v568_v9  ;;  %v572_v11 = vld [vmem:[%s3663_s0 + $0x858] sm:$0xff]  ;;  %v574_v12 = vld [vmem:[%s3663_s0 + $0x860] sm:$0xff] }
  0x87   :  { %571 = vst [vmem:[%s3664_s1 + $0x850] sm:$0xff] %v570_v10  ;;  %v576_v13 = vld [vmem:[%s3663_s0 + $0x868] sm:$0xff]  ;;  %573 = vst [vmem:[%s3664_s1 + $0x858] sm:$0xff] %v572_v11  ;;  %v578_v14 = vld [vmem:[%s3663_s0 + $0x870] sm:$0xff] }
  0x88   :  { %575 = vst [vmem:[%s3664_s1 + $0x860] sm:$0xff] %v574_v12  ;;  %577 = vst [vmem:[%s3664_s1 + $0x868] sm:$0xff] %v576_v13  ;;  %v580_v15 = vld [vmem:[%s3663_s0 + $0x878] sm:$0xff]  ;;  %v582_v16 = vld [vmem:[%s3663_s0 + $0x880] sm:$0xff] }
  0x89   :  { %579 = vst [vmem:[%s3664_s1 + $0x870] sm:$0xff] %v578_v14  ;;  %581 = vst [vmem:[%s3664_s1 + $0x878] sm:$0xff] %v580_v15  ;;  %v584_v17 = vld [vmem:[%s3663_s0 + $0x888] sm:$0xff]  ;;  %v586_v18 = vld [vmem:[%s3663_s0 + $0x890] sm:$0xff] }
  0x8a   :  { %583 = vst [vmem:[%s3664_s1 + $0x880] sm:$0xff] %v582_v16  ;;  %v588_v19 = vld [vmem:[%s3663_s0 + $0x898] sm:$0xff]  ;;  %585 = vst [vmem:[%s3664_s1 + $0x888] sm:$0xff] %v584_v17  ;;  %v590_v20 = vld [vmem:[%s3663_s0 + $0x8a0] sm:$0xff] }
  0x8b   :  { %587 = vst [vmem:[%s3664_s1 + $0x890] sm:$0xff] %v586_v18  ;;  %589 = vst [vmem:[%s3664_s1 + $0x898] sm:$0xff] %v588_v19  ;;  %v592_v21 = vld [vmem:[%s3663_s0 + $0x8a8] sm:$0xff]  ;;  %v594_v22 = vld [vmem:[%s3663_s0 + $0x8b0] sm:$0xff] }
  0x8c   :  { %591 = vst [vmem:[%s3664_s1 + $0x8a0] sm:$0xff] %v590_v20  ;;  %593 = vst [vmem:[%s3664_s1 + $0x8a8] sm:$0xff] %v592_v21  ;;  %v596_v23 = vld [vmem:[%s3663_s0 + $0x8b8] sm:$0xff]  ;;  %v598_v24 = vld [vmem:[%s3663_s0 + $0x8c0] sm:$0xff] }
  0x8d   :  { %595 = vst [vmem:[%s3664_s1 + $0x8b0] sm:$0xff] %v594_v22  ;;  %v600_v25 = vld [vmem:[%s3663_s0 + $0x8c8] sm:$0xff]  ;;  %597 = vst [vmem:[%s3664_s1 + $0x8b8] sm:$0xff] %v596_v23  ;;  %v602_v26 = vld [vmem:[%s3663_s0 + $0x8d0] sm:$0xff] }
  0x8e   :  { %599 = vst [vmem:[%s3664_s1 + $0x8c0] sm:$0xff] %v598_v24  ;;  %601 = vst [vmem:[%s3664_s1 + $0x8c8] sm:$0xff] %v600_v25  ;;  %v604_v27 = vld [vmem:[%s3663_s0 + $0x8d8] sm:$0xff]  ;;  %v606_v28 = vld [vmem:[%s3663_s0 + $0x8e0] sm:$0xff] }
  0x8f   :  { %603 = vst [vmem:[%s3664_s1 + $0x8d0] sm:$0xff] %v602_v26  ;;  %605 = vst [vmem:[%s3664_s1 + $0x8d8] sm:$0xff] %v604_v27  ;;  %v608_v29 = vld [vmem:[%s3663_s0 + $0x8e8] sm:$0xff]  ;;  %v610_v30 = vld [vmem:[%s3663_s0 + $0x8f0] sm:$0xff] }
  0x90   :  { %607 = vst [vmem:[%s3664_s1 + $0x8e0] sm:$0xff] %v606_v28  ;;  %v612_v31 = vld [vmem:[%s3663_s0 + $0x8f8] sm:$0xff]  ;;  %609 = vst [vmem:[%s3664_s1 + $0x8e8] sm:$0xff] %v608_v29  ;;  %v614_v32 = vld [vmem:[%s3663_s0 + $0x900] sm:$0xff] }
  0x91   :  { %611 = vst [vmem:[%s3664_s1 + $0x8f0] sm:$0xff] %v610_v30  ;;  %613 = vst [vmem:[%s3664_s1 + $0x8f8] sm:$0xff] %v612_v31  ;;  %v616_v33 = vld [vmem:[%s3663_s0 + $0x908] sm:$0xff]  ;;  %v618_v34 = vld [vmem:[%s3663_s0 + $0x910] sm:$0xff] }
  0x92   :  { %615 = vst [vmem:[%s3664_s1 + $0x900] sm:$0xff] %v614_v32  ;;  %617 = vst [vmem:[%s3664_s1 + $0x908] sm:$0xff] %v616_v33  ;;  %v620_v35 = vld [vmem:[%s3663_s0 + $0x918] sm:$0xff]  ;;  %v622_v36 = vld [vmem:[%s3663_s0 + $0x920] sm:$0xff] }
  0x93   :  { %619 = vst [vmem:[%s3664_s1 + $0x910] sm:$0xff] %v618_v34  ;;  %v624_v37 = vld [vmem:[%s3663_s0 + $0x928] sm:$0xff]  ;;  %621 = vst [vmem:[%s3664_s1 + $0x918] sm:$0xff] %v620_v35  ;;  %v626_v38 = vld [vmem:[%s3663_s0 + $0x930] sm:$0xff] }
  0x94   :  { %623 = vst [vmem:[%s3664_s1 + $0x920] sm:$0xff] %v622_v36  ;;  %625 = vst [vmem:[%s3664_s1 + $0x928] sm:$0xff] %v624_v37  ;;  %v628_v39 = vld [vmem:[%s3663_s0 + $0x938] sm:$0xff]  ;;  %v630_v40 = vld [vmem:[%s3663_s0 + $0x940] sm:$0xff] }
  0x95   :  { %627 = vst [vmem:[%s3664_s1 + $0x930] sm:$0xff] %v626_v38  ;;  %629 = vst [vmem:[%s3664_s1 + $0x938] sm:$0xff] %v628_v39  ;;  %v632_v41 = vld [vmem:[%s3663_s0 + $0x948] sm:$0xff]  ;;  %v634_v42 = vld [vmem:[%s3663_s0 + $0x950] sm:$0xff] }
  0x96   :  { %631 = vst [vmem:[%s3664_s1 + $0x940] sm:$0xff] %v630_v40  ;;  %v636_v43 = vld [vmem:[%s3663_s0 + $0x958] sm:$0xff]  ;;  %633 = vst [vmem:[%s3664_s1 + $0x948] sm:$0xff] %v632_v41  ;;  %v638_v44 = vld [vmem:[%s3663_s0 + $0x960] sm:$0xff] }
  0x97   :  { %635 = vst [vmem:[%s3664_s1 + $0x950] sm:$0xff] %v634_v42  ;;  %637 = vst [vmem:[%s3664_s1 + $0x958] sm:$0xff] %v636_v43  ;;  %v640_v45 = vld [vmem:[%s3663_s0 + $0x968] sm:$0xff]  ;;  %v642_v46 = vld [vmem:[%s3663_s0 + $0x970] sm:$0xff] }
  0x98   :  { %639 = vst [vmem:[%s3664_s1 + $0x960] sm:$0xff] %v638_v44  ;;  %641 = vst [vmem:[%s3664_s1 + $0x968] sm:$0xff] %v640_v45  ;;  %v644_v47 = vld [vmem:[%s3663_s0 + $0x978] sm:$0xff]  ;;  %v646_v48 = vld [vmem:[%s3663_s0 + $0x980] sm:$0xff] }
  0x99   :  { %643 = vst [vmem:[%s3664_s1 + $0x970] sm:$0xff] %v642_v46  ;;  %v648_v49 = vld [vmem:[%s3663_s0 + $0x988] sm:$0xff]  ;;  %645 = vst [vmem:[%s3664_s1 + $0x978] sm:$0xff] %v644_v47  ;;  %v650_v50 = vld [vmem:[%s3663_s0 + $0x990] sm:$0xff] }
  0x9a   :  { %647 = vst [vmem:[%s3664_s1 + $0x980] sm:$0xff] %v646_v48  ;;  %649 = vst [vmem:[%s3664_s1 + $0x988] sm:$0xff] %v648_v49  ;;  %v652_v51 = vld [vmem:[%s3663_s0 + $0x998] sm:$0xff]  ;;  %v654_v52 = vld [vmem:[%s3663_s0 + $0x9a0] sm:$0xff] }
  0x9b   :  { %651 = vst [vmem:[%s3664_s1 + $0x990] sm:$0xff] %v650_v50  ;;  %653 = vst [vmem:[%s3664_s1 + $0x998] sm:$0xff] %v652_v51  ;;  %v656_v53 = vld [vmem:[%s3663_s0 + $0x9a8] sm:$0xff]  ;;  %v658_v54 = vld [vmem:[%s3663_s0 + $0x9b0] sm:$0xff] }
  0x9c   :  { %655 = vst [vmem:[%s3664_s1 + $0x9a0] sm:$0xff] %v654_v52  ;;  %v660_v55 = vld [vmem:[%s3663_s0 + $0x9b8] sm:$0xff]  ;;  %657 = vst [vmem:[%s3664_s1 + $0x9a8] sm:$0xff] %v656_v53  ;;  %v662_v56 = vld [vmem:[%s3663_s0 + $0x9c0] sm:$0xff] }
  0x9d   :  { %659 = vst [vmem:[%s3664_s1 + $0x9b0] sm:$0xff] %v658_v54  ;;  %661 = vst [vmem:[%s3664_s1 + $0x9b8] sm:$0xff] %v660_v55  ;;  %v664_v57 = vld [vmem:[%s3663_s0 + $0x9c8] sm:$0xff]  ;;  %v666_v58 = vld [vmem:[%s3663_s0 + $0x9d0] sm:$0xff] }
  0x9e   :  { %663 = vst [vmem:[%s3664_s1 + $0x9c0] sm:$0xff] %v662_v56  ;;  %665 = vst [vmem:[%s3664_s1 + $0x9c8] sm:$0xff] %v664_v57  ;;  %v668_v59 = vld [vmem:[%s3663_s0 + $0x9d8] sm:$0xff]  ;;  %v670_v60 = vld [vmem:[%s3663_s0 + $0x9e0] sm:$0xff] }
  0x9f   :  { %667 = vst [vmem:[%s3664_s1 + $0x9d0] sm:$0xff] %v666_v58  ;;  %v672_v61 = vld [vmem:[%s3663_s0 + $0x9e8] sm:$0xff]  ;;  %669 = vst [vmem:[%s3664_s1 + $0x9d8] sm:$0xff] %v668_v59  ;;  %v674_v62 = vld [vmem:[%s3663_s0 + $0x9f0] sm:$0xff] }
  0xa0   :  { %671 = vst [vmem:[%s3664_s1 + $0x9e0] sm:$0xff] %v670_v60  ;;  %673 = vst [vmem:[%s3664_s1 + $0x9e8] sm:$0xff] %v672_v61  ;;  %v676_v63 = vld [vmem:[%s3663_s0 + $0x9f8] sm:$0xff]  ;;  %v678_v0 = vld [vmem:[%s3663_s0 + $0xa00] sm:$0xff] }
  0xa1   :  { %675 = vst [vmem:[%s3664_s1 + $0x9f0] sm:$0xff] %v674_v62  ;;  %677 = vst [vmem:[%s3664_s1 + $0x9f8] sm:$0xff] %v676_v63  ;;  %v680_v1 = vld [vmem:[%s3663_s0 + $0xa08] sm:$0xff]  ;;  %v682_v2 = vld [vmem:[%s3663_s0 + $0xa10] sm:$0xff] }
  0xa2   :  { %679 = vst [vmem:[%s3664_s1 + $0xa00] sm:$0xff] %v678_v0  ;;  %v684_v3 = vld [vmem:[%s3663_s0 + $0xa18] sm:$0xff]  ;;  %681 = vst [vmem:[%s3664_s1 + $0xa08] sm:$0xff] %v680_v1  ;;  %v686_v4 = vld [vmem:[%s3663_s0 + $0xa20] sm:$0xff] }
  0xa3   :  { %683 = vst [vmem:[%s3664_s1 + $0xa10] sm:$0xff] %v682_v2  ;;  %685 = vst [vmem:[%s3664_s1 + $0xa18] sm:$0xff] %v684_v3  ;;  %v688_v5 = vld [vmem:[%s3663_s0 + $0xa28] sm:$0xff]  ;;  %v690_v6 = vld [vmem:[%s3663_s0 + $0xa30] sm:$0xff] }
  0xa4   :  { %687 = vst [vmem:[%s3664_s1 + $0xa20] sm:$0xff] %v686_v4  ;;  %689 = vst [vmem:[%s3664_s1 + $0xa28] sm:$0xff] %v688_v5  ;;  %v692_v7 = vld [vmem:[%s3663_s0 + $0xa38] sm:$0xff]  ;;  %v694_v8 = vld [vmem:[%s3663_s0 + $0xa40] sm:$0xff] }
  0xa5   :  { %691 = vst [vmem:[%s3664_s1 + $0xa30] sm:$0xff] %v690_v6  ;;  %v696_v9 = vld [vmem:[%s3663_s0 + $0xa48] sm:$0xff]  ;;  %693 = vst [vmem:[%s3664_s1 + $0xa38] sm:$0xff] %v692_v7  ;;  %v698_v10 = vld [vmem:[%s3663_s0 + $0xa50] sm:$0xff] }
  0xa6   :  { %695 = vst [vmem:[%s3664_s1 + $0xa40] sm:$0xff] %v694_v8  ;;  %697 = vst [vmem:[%s3664_s1 + $0xa48] sm:$0xff] %v696_v9  ;;  %v700_v11 = vld [vmem:[%s3663_s0 + $0xa58] sm:$0xff]  ;;  %v702_v12 = vld [vmem:[%s3663_s0 + $0xa60] sm:$0xff] }
  0xa7   :  { %699 = vst [vmem:[%s3664_s1 + $0xa50] sm:$0xff] %v698_v10  ;;  %701 = vst [vmem:[%s3664_s1 + $0xa58] sm:$0xff] %v700_v11  ;;  %v704_v13 = vld [vmem:[%s3663_s0 + $0xa68] sm:$0xff]  ;;  %v706_v14 = vld [vmem:[%s3663_s0 + $0xa70] sm:$0xff] }
  0xa8   :  { %703 = vst [vmem:[%s3664_s1 + $0xa60] sm:$0xff] %v702_v12  ;;  %v708_v15 = vld [vmem:[%s3663_s0 + $0xa78] sm:$0xff]  ;;  %705 = vst [vmem:[%s3664_s1 + $0xa68] sm:$0xff] %v704_v13  ;;  %v710_v16 = vld [vmem:[%s3663_s0 + $0xa80] sm:$0xff] }
  0xa9   :  { %707 = vst [vmem:[%s3664_s1 + $0xa70] sm:$0xff] %v706_v14  ;;  %709 = vst [vmem:[%s3664_s1 + $0xa78] sm:$0xff] %v708_v15  ;;  %v712_v17 = vld [vmem:[%s3663_s0 + $0xa88] sm:$0xff]  ;;  %v714_v18 = vld [vmem:[%s3663_s0 + $0xa90] sm:$0xff] }
  0xaa   :  { %711 = vst [vmem:[%s3664_s1 + $0xa80] sm:$0xff] %v710_v16  ;;  %713 = vst [vmem:[%s3664_s1 + $0xa88] sm:$0xff] %v712_v17  ;;  %v716_v19 = vld [vmem:[%s3663_s0 + $0xa98] sm:$0xff]  ;;  %v718_v20 = vld [vmem:[%s3663_s0 + $0xaa0] sm:$0xff] }
  0xab   :  { %715 = vst [vmem:[%s3664_s1 + $0xa90] sm:$0xff] %v714_v18  ;;  %v720_v21 = vld [vmem:[%s3663_s0 + $0xaa8] sm:$0xff]  ;;  %717 = vst [vmem:[%s3664_s1 + $0xa98] sm:$0xff] %v716_v19  ;;  %v722_v22 = vld [vmem:[%s3663_s0 + $0xab0] sm:$0xff] }
  0xac   :  { %719 = vst [vmem:[%s3664_s1 + $0xaa0] sm:$0xff] %v718_v20  ;;  %721 = vst [vmem:[%s3664_s1 + $0xaa8] sm:$0xff] %v720_v21  ;;  %v724_v23 = vld [vmem:[%s3663_s0 + $0xab8] sm:$0xff]  ;;  %v726_v24 = vld [vmem:[%s3663_s0 + $0xac0] sm:$0xff] }
  0xad   :  { %723 = vst [vmem:[%s3664_s1 + $0xab0] sm:$0xff] %v722_v22  ;;  %725 = vst [vmem:[%s3664_s1 + $0xab8] sm:$0xff] %v724_v23  ;;  %v728_v25 = vld [vmem:[%s3663_s0 + $0xac8] sm:$0xff]  ;;  %v730_v26 = vld [vmem:[%s3663_s0 + $0xad0] sm:$0xff] }
  0xae   :  { %727 = vst [vmem:[%s3664_s1 + $0xac0] sm:$0xff] %v726_v24  ;;  %v732_v27 = vld [vmem:[%s3663_s0 + $0xad8] sm:$0xff]  ;;  %729 = vst [vmem:[%s3664_s1 + $0xac8] sm:$0xff] %v728_v25  ;;  %v734_v28 = vld [vmem:[%s3663_s0 + $0xae0] sm:$0xff] }
  0xaf   :  { %731 = vst [vmem:[%s3664_s1 + $0xad0] sm:$0xff] %v730_v26  ;;  %733 = vst [vmem:[%s3664_s1 + $0xad8] sm:$0xff] %v732_v27  ;;  %v736_v29 = vld [vmem:[%s3663_s0 + $0xae8] sm:$0xff]  ;;  %v738_v30 = vld [vmem:[%s3663_s0 + $0xaf0] sm:$0xff] }
  0xb0   :  { %735 = vst [vmem:[%s3664_s1 + $0xae0] sm:$0xff] %v734_v28  ;;  %737 = vst [vmem:[%s3664_s1 + $0xae8] sm:$0xff] %v736_v29  ;;  %v740_v31 = vld [vmem:[%s3663_s0 + $0xaf8] sm:$0xff]  ;;  %v742_v32 = vld [vmem:[%s3663_s0 + $0xb00] sm:$0xff] }
  0xb1   :  { %739 = vst [vmem:[%s3664_s1 + $0xaf0] sm:$0xff] %v738_v30  ;;  %v744_v33 = vld [vmem:[%s3663_s0 + $0xb08] sm:$0xff]  ;;  %741 = vst [vmem:[%s3664_s1 + $0xaf8] sm:$0xff] %v740_v31  ;;  %v746_v34 = vld [vmem:[%s3663_s0 + $0xb10] sm:$0xff] }
  0xb2   :  { %743 = vst [vmem:[%s3664_s1 + $0xb00] sm:$0xff] %v742_v32  ;;  %745 = vst [vmem:[%s3664_s1 + $0xb08] sm:$0xff] %v744_v33  ;;  %v748_v35 = vld [vmem:[%s3663_s0 + $0xb18] sm:$0xff]  ;;  %v750_v36 = vld [vmem:[%s3663_s0 + $0xb20] sm:$0xff] }
  0xb3   :  { %747 = vst [vmem:[%s3664_s1 + $0xb10] sm:$0xff] %v746_v34  ;;  %749 = vst [vmem:[%s3664_s1 + $0xb18] sm:$0xff] %v748_v35  ;;  %v752_v37 = vld [vmem:[%s3663_s0 + $0xb28] sm:$0xff]  ;;  %v754_v38 = vld [vmem:[%s3663_s0 + $0xb30] sm:$0xff] }
  0xb4   :  { %751 = vst [vmem:[%s3664_s1 + $0xb20] sm:$0xff] %v750_v36  ;;  %v756_v39 = vld [vmem:[%s3663_s0 + $0xb38] sm:$0xff]  ;;  %753 = vst [vmem:[%s3664_s1 + $0xb28] sm:$0xff] %v752_v37  ;;  %v758_v40 = vld [vmem:[%s3663_s0 + $0xb40] sm:$0xff] }
  0xb5   :  { %755 = vst [vmem:[%s3664_s1 + $0xb30] sm:$0xff] %v754_v38  ;;  %757 = vst [vmem:[%s3664_s1 + $0xb38] sm:$0xff] %v756_v39  ;;  %v760_v41 = vld [vmem:[%s3663_s0 + $0xb48] sm:$0xff]  ;;  %v762_v42 = vld [vmem:[%s3663_s0 + $0xb50] sm:$0xff] }
  0xb6   :  { %759 = vst [vmem:[%s3664_s1 + $0xb40] sm:$0xff] %v758_v40  ;;  %761 = vst [vmem:[%s3664_s1 + $0xb48] sm:$0xff] %v760_v41  ;;  %v764_v43 = vld [vmem:[%s3663_s0 + $0xb58] sm:$0xff]  ;;  %v766_v44 = vld [vmem:[%s3663_s0 + $0xb60] sm:$0xff] }
  0xb7   :  { %763 = vst [vmem:[%s3664_s1 + $0xb50] sm:$0xff] %v762_v42  ;;  %v768_v45 = vld [vmem:[%s3663_s0 + $0xb68] sm:$0xff]  ;;  %765 = vst [vmem:[%s3664_s1 + $0xb58] sm:$0xff] %v764_v43  ;;  %v770_v46 = vld [vmem:[%s3663_s0 + $0xb70] sm:$0xff] }
  0xb8   :  { %767 = vst [vmem:[%s3664_s1 + $0xb60] sm:$0xff] %v766_v44  ;;  %769 = vst [vmem:[%s3664_s1 + $0xb68] sm:$0xff] %v768_v45  ;;  %v772_v47 = vld [vmem:[%s3663_s0 + $0xb78] sm:$0xff]  ;;  %v774_v48 = vld [vmem:[%s3663_s0 + $0xb80] sm:$0xff] }
  0xb9   :  { %771 = vst [vmem:[%s3664_s1 + $0xb70] sm:$0xff] %v770_v46  ;;  %773 = vst [vmem:[%s3664_s1 + $0xb78] sm:$0xff] %v772_v47  ;;  %v776_v49 = vld [vmem:[%s3663_s0 + $0xb88] sm:$0xff]  ;;  %v778_v50 = vld [vmem:[%s3663_s0 + $0xb90] sm:$0xff] }
  0xba   :  { %775 = vst [vmem:[%s3664_s1 + $0xb80] sm:$0xff] %v774_v48  ;;  %v780_v51 = vld [vmem:[%s3663_s0 + $0xb98] sm:$0xff]  ;;  %777 = vst [vmem:[%s3664_s1 + $0xb88] sm:$0xff] %v776_v49  ;;  %v782_v52 = vld [vmem:[%s3663_s0 + $0xba0] sm:$0xff] }
  0xbb   :  { %779 = vst [vmem:[%s3664_s1 + $0xb90] sm:$0xff] %v778_v50  ;;  %781 = vst [vmem:[%s3664_s1 + $0xb98] sm:$0xff] %v780_v51  ;;  %v784_v53 = vld [vmem:[%s3663_s0 + $0xba8] sm:$0xff]  ;;  %v786_v54 = vld [vmem:[%s3663_s0 + $0xbb0] sm:$0xff] }
  0xbc   :  { %783 = vst [vmem:[%s3664_s1 + $0xba0] sm:$0xff] %v782_v52  ;;  %785 = vst [vmem:[%s3664_s1 + $0xba8] sm:$0xff] %v784_v53  ;;  %v788_v55 = vld [vmem:[%s3663_s0 + $0xbb8] sm:$0xff]  ;;  %v790_v56 = vld [vmem:[%s3663_s0 + $0xbc0] sm:$0xff] }
  0xbd   :  { %787 = vst [vmem:[%s3664_s1 + $0xbb0] sm:$0xff] %v786_v54  ;;  %v792_v57 = vld [vmem:[%s3663_s0 + $0xbc8] sm:$0xff]  ;;  %789 = vst [vmem:[%s3664_s1 + $0xbb8] sm:$0xff] %v788_v55  ;;  %v794_v58 = vld [vmem:[%s3663_s0 + $0xbd0] sm:$0xff] }
  0xbe   :  { %791 = vst [vmem:[%s3664_s1 + $0xbc0] sm:$0xff] %v790_v56  ;;  %793 = vst [vmem:[%s3664_s1 + $0xbc8] sm:$0xff] %v792_v57  ;;  %v796_v59 = vld [vmem:[%s3663_s0 + $0xbd8] sm:$0xff]  ;;  %v798_v60 = vld [vmem:[%s3663_s0 + $0xbe0] sm:$0xff] }
  0xbf   :  { %795 = vst [vmem:[%s3664_s1 + $0xbd0] sm:$0xff] %v794_v58  ;;  %797 = vst [vmem:[%s3664_s1 + $0xbd8] sm:$0xff] %v796_v59  ;;  %v800_v61 = vld [vmem:[%s3663_s0 + $0xbe8] sm:$0xff]  ;;  %v802_v62 = vld [vmem:[%s3663_s0 + $0xbf0] sm:$0xff] }
  0xc0   :  { %799 = vst [vmem:[%s3664_s1 + $0xbe0] sm:$0xff] %v798_v60  ;;  %v804_v63 = vld [vmem:[%s3663_s0 + $0xbf8] sm:$0xff]  ;;  %801 = vst [vmem:[%s3664_s1 + $0xbe8] sm:$0xff] %v800_v61  ;;  %v806_v0 = vld [vmem:[%s3663_s0 + $0xc00] sm:$0xff] }
  0xc1   :  { %803 = vst [vmem:[%s3664_s1 + $0xbf0] sm:$0xff] %v802_v62  ;;  %805 = vst [vmem:[%s3664_s1 + $0xbf8] sm:$0xff] %v804_v63  ;;  %v808_v1 = vld [vmem:[%s3663_s0 + $0xc08] sm:$0xff]  ;;  %v810_v2 = vld [vmem:[%s3663_s0 + $0xc10] sm:$0xff] }
  0xc2   :  { %807 = vst [vmem:[%s3664_s1 + $0xc00] sm:$0xff] %v806_v0  ;;  %809 = vst [vmem:[%s3664_s1 + $0xc08] sm:$0xff] %v808_v1  ;;  %v812_v3 = vld [vmem:[%s3663_s0 + $0xc18] sm:$0xff]  ;;  %v814_v4 = vld [vmem:[%s3663_s0 + $0xc20] sm:$0xff] }
  0xc3   :  { %811 = vst [vmem:[%s3664_s1 + $0xc10] sm:$0xff] %v810_v2  ;;  %v816_v5 = vld [vmem:[%s3663_s0 + $0xc28] sm:$0xff]  ;;  %813 = vst [vmem:[%s3664_s1 + $0xc18] sm:$0xff] %v812_v3  ;;  %v818_v6 = vld [vmem:[%s3663_s0 + $0xc30] sm:$0xff] }
  0xc4   :  { %815 = vst [vmem:[%s3664_s1 + $0xc20] sm:$0xff] %v814_v4  ;;  %817 = vst [vmem:[%s3664_s1 + $0xc28] sm:$0xff] %v816_v5  ;;  %v820_v7 = vld [vmem:[%s3663_s0 + $0xc38] sm:$0xff]  ;;  %v822_v8 = vld [vmem:[%s3663_s0 + $0xc40] sm:$0xff] }
  0xc5   :  { %819 = vst [vmem:[%s3664_s1 + $0xc30] sm:$0xff] %v818_v6  ;;  %821 = vst [vmem:[%s3664_s1 + $0xc38] sm:$0xff] %v820_v7  ;;  %v824_v9 = vld [vmem:[%s3663_s0 + $0xc48] sm:$0xff]  ;;  %v826_v10 = vld [vmem:[%s3663_s0 + $0xc50] sm:$0xff] }
  0xc6   :  { %823 = vst [vmem:[%s3664_s1 + $0xc40] sm:$0xff] %v822_v8  ;;  %v828_v11 = vld [vmem:[%s3663_s0 + $0xc58] sm:$0xff]  ;;  %825 = vst [vmem:[%s3664_s1 + $0xc48] sm:$0xff] %v824_v9  ;;  %v830_v12 = vld [vmem:[%s3663_s0 + $0xc60] sm:$0xff] }
  0xc7   :  { %827 = vst [vmem:[%s3664_s1 + $0xc50] sm:$0xff] %v826_v10  ;;  %829 = vst [vmem:[%s3664_s1 + $0xc58] sm:$0xff] %v828_v11  ;;  %v832_v13 = vld [vmem:[%s3663_s0 + $0xc68] sm:$0xff]  ;;  %v834_v14 = vld [vmem:[%s3663_s0 + $0xc70] sm:$0xff] }
  0xc8   :  { %831 = vst [vmem:[%s3664_s1 + $0xc60] sm:$0xff] %v830_v12  ;;  %833 = vst [vmem:[%s3664_s1 + $0xc68] sm:$0xff] %v832_v13  ;;  %v836_v15 = vld [vmem:[%s3663_s0 + $0xc78] sm:$0xff]  ;;  %v838_v16 = vld [vmem:[%s3663_s0 + $0xc80] sm:$0xff] }
  0xc9   :  { %835 = vst [vmem:[%s3664_s1 + $0xc70] sm:$0xff] %v834_v14  ;;  %v840_v17 = vld [vmem:[%s3663_s0 + $0xc88] sm:$0xff]  ;;  %837 = vst [vmem:[%s3664_s1 + $0xc78] sm:$0xff] %v836_v15  ;;  %v842_v18 = vld [vmem:[%s3663_s0 + $0xc90] sm:$0xff] }
  0xca   :  { %839 = vst [vmem:[%s3664_s1 + $0xc80] sm:$0xff] %v838_v16  ;;  %841 = vst [vmem:[%s3664_s1 + $0xc88] sm:$0xff] %v840_v17  ;;  %v844_v19 = vld [vmem:[%s3663_s0 + $0xc98] sm:$0xff]  ;;  %v846_v20 = vld [vmem:[%s3663_s0 + $0xca0] sm:$0xff] }
  0xcb   :  { %843 = vst [vmem:[%s3664_s1 + $0xc90] sm:$0xff] %v842_v18  ;;  %845 = vst [vmem:[%s3664_s1 + $0xc98] sm:$0xff] %v844_v19  ;;  %v848_v21 = vld [vmem:[%s3663_s0 + $0xca8] sm:$0xff]  ;;  %v850_v22 = vld [vmem:[%s3663_s0 + $0xcb0] sm:$0xff] }
  0xcc   :  { %847 = vst [vmem:[%s3664_s1 + $0xca0] sm:$0xff] %v846_v20  ;;  %v852_v23 = vld [vmem:[%s3663_s0 + $0xcb8] sm:$0xff]  ;;  %849 = vst [vmem:[%s3664_s1 + $0xca8] sm:$0xff] %v848_v21  ;;  %v854_v24 = vld [vmem:[%s3663_s0 + $0xcc0] sm:$0xff] }
  0xcd   :  { %851 = vst [vmem:[%s3664_s1 + $0xcb0] sm:$0xff] %v850_v22  ;;  %853 = vst [vmem:[%s3664_s1 + $0xcb8] sm:$0xff] %v852_v23  ;;  %v856_v25 = vld [vmem:[%s3663_s0 + $0xcc8] sm:$0xff]  ;;  %v858_v26 = vld [vmem:[%s3663_s0 + $0xcd0] sm:$0xff] }
  0xce   :  { %855 = vst [vmem:[%s3664_s1 + $0xcc0] sm:$0xff] %v854_v24  ;;  %857 = vst [vmem:[%s3664_s1 + $0xcc8] sm:$0xff] %v856_v25  ;;  %v860_v27 = vld [vmem:[%s3663_s0 + $0xcd8] sm:$0xff]  ;;  %v862_v28 = vld [vmem:[%s3663_s0 + $0xce0] sm:$0xff] }
  0xcf   :  { %859 = vst [vmem:[%s3664_s1 + $0xcd0] sm:$0xff] %v858_v26  ;;  %v864_v29 = vld [vmem:[%s3663_s0 + $0xce8] sm:$0xff]  ;;  %861 = vst [vmem:[%s3664_s1 + $0xcd8] sm:$0xff] %v860_v27  ;;  %v866_v30 = vld [vmem:[%s3663_s0 + $0xcf0] sm:$0xff] }
  0xd0   :  { %863 = vst [vmem:[%s3664_s1 + $0xce0] sm:$0xff] %v862_v28  ;;  %865 = vst [vmem:[%s3664_s1 + $0xce8] sm:$0xff] %v864_v29  ;;  %v868_v31 = vld [vmem:[%s3663_s0 + $0xcf8] sm:$0xff]  ;;  %v870_v32 = vld [vmem:[%s3663_s0 + $0xd00] sm:$0xff] }
  0xd1   :  { %867 = vst [vmem:[%s3664_s1 + $0xcf0] sm:$0xff] %v866_v30  ;;  %869 = vst [vmem:[%s3664_s1 + $0xcf8] sm:$0xff] %v868_v31  ;;  %v872_v33 = vld [vmem:[%s3663_s0 + $0xd08] sm:$0xff]  ;;  %v874_v34 = vld [vmem:[%s3663_s0 + $0xd10] sm:$0xff] }
  0xd2   :  { %871 = vst [vmem:[%s3664_s1 + $0xd00] sm:$0xff] %v870_v32  ;;  %v876_v35 = vld [vmem:[%s3663_s0 + $0xd18] sm:$0xff]  ;;  %873 = vst [vmem:[%s3664_s1 + $0xd08] sm:$0xff] %v872_v33  ;;  %v878_v36 = vld [vmem:[%s3663_s0 + $0xd20] sm:$0xff] }
  0xd3   :  { %875 = vst [vmem:[%s3664_s1 + $0xd10] sm:$0xff] %v874_v34  ;;  %877 = vst [vmem:[%s3664_s1 + $0xd18] sm:$0xff] %v876_v35  ;;  %v880_v37 = vld [vmem:[%s3663_s0 + $0xd28] sm:$0xff]  ;;  %v882_v38 = vld [vmem:[%s3663_s0 + $0xd30] sm:$0xff] }
  0xd4   :  { %879 = vst [vmem:[%s3664_s1 + $0xd20] sm:$0xff] %v878_v36  ;;  %881 = vst [vmem:[%s3664_s1 + $0xd28] sm:$0xff] %v880_v37  ;;  %v884_v39 = vld [vmem:[%s3663_s0 + $0xd38] sm:$0xff]  ;;  %v886_v40 = vld [vmem:[%s3663_s0 + $0xd40] sm:$0xff] }
  0xd5   :  { %883 = vst [vmem:[%s3664_s1 + $0xd30] sm:$0xff] %v882_v38  ;;  %v888_v41 = vld [vmem:[%s3663_s0 + $0xd48] sm:$0xff]  ;;  %885 = vst [vmem:[%s3664_s1 + $0xd38] sm:$0xff] %v884_v39  ;;  %v890_v42 = vld [vmem:[%s3663_s0 + $0xd50] sm:$0xff] }
  0xd6   :  { %887 = vst [vmem:[%s3664_s1 + $0xd40] sm:$0xff] %v886_v40  ;;  %889 = vst [vmem:[%s3664_s1 + $0xd48] sm:$0xff] %v888_v41  ;;  %v892_v43 = vld [vmem:[%s3663_s0 + $0xd58] sm:$0xff]  ;;  %v894_v44 = vld [vmem:[%s3663_s0 + $0xd60] sm:$0xff] }
  0xd7   :  { %891 = vst [vmem:[%s3664_s1 + $0xd50] sm:$0xff] %v890_v42  ;;  %893 = vst [vmem:[%s3664_s1 + $0xd58] sm:$0xff] %v892_v43  ;;  %v896_v45 = vld [vmem:[%s3663_s0 + $0xd68] sm:$0xff]  ;;  %v898_v46 = vld [vmem:[%s3663_s0 + $0xd70] sm:$0xff] }
  0xd8   :  { %895 = vst [vmem:[%s3664_s1 + $0xd60] sm:$0xff] %v894_v44  ;;  %v900_v47 = vld [vmem:[%s3663_s0 + $0xd78] sm:$0xff]  ;;  %897 = vst [vmem:[%s3664_s1 + $0xd68] sm:$0xff] %v896_v45  ;;  %v902_v48 = vld [vmem:[%s3663_s0 + $0xd80] sm:$0xff] }
  0xd9   :  { %899 = vst [vmem:[%s3664_s1 + $0xd70] sm:$0xff] %v898_v46  ;;  %901 = vst [vmem:[%s3664_s1 + $0xd78] sm:$0xff] %v900_v47  ;;  %v904_v49 = vld [vmem:[%s3663_s0 + $0xd88] sm:$0xff]  ;;  %v906_v50 = vld [vmem:[%s3663_s0 + $0xd90] sm:$0xff] }
  0xda   :  { %903 = vst [vmem:[%s3664_s1 + $0xd80] sm:$0xff] %v902_v48  ;;  %905 = vst [vmem:[%s3664_s1 + $0xd88] sm:$0xff] %v904_v49  ;;  %v908_v51 = vld [vmem:[%s3663_s0 + $0xd98] sm:$0xff]  ;;  %v910_v52 = vld [vmem:[%s3663_s0 + $0xda0] sm:$0xff] }
  0xdb   :  { %907 = vst [vmem:[%s3664_s1 + $0xd90] sm:$0xff] %v906_v50  ;;  %v912_v53 = vld [vmem:[%s3663_s0 + $0xda8] sm:$0xff]  ;;  %909 = vst [vmem:[%s3664_s1 + $0xd98] sm:$0xff] %v908_v51  ;;  %v914_v54 = vld [vmem:[%s3663_s0 + $0xdb0] sm:$0xff] }
  0xdc   :  { %911 = vst [vmem:[%s3664_s1 + $0xda0] sm:$0xff] %v910_v52  ;;  %913 = vst [vmem:[%s3664_s1 + $0xda8] sm:$0xff] %v912_v53  ;;  %v916_v55 = vld [vmem:[%s3663_s0 + $0xdb8] sm:$0xff]  ;;  %v918_v56 = vld [vmem:[%s3663_s0 + $0xdc0] sm:$0xff] }
  0xdd   :  { %915 = vst [vmem:[%s3664_s1 + $0xdb0] sm:$0xff] %v914_v54  ;;  %917 = vst [vmem:[%s3664_s1 + $0xdb8] sm:$0xff] %v916_v55  ;;  %v920_v57 = vld [vmem:[%s3663_s0 + $0xdc8] sm:$0xff]  ;;  %v922_v58 = vld [vmem:[%s3663_s0 + $0xdd0] sm:$0xff] }
  0xde   :  { %919 = vst [vmem:[%s3664_s1 + $0xdc0] sm:$0xff] %v918_v56  ;;  %v924_v59 = vld [vmem:[%s3663_s0 + $0xdd8] sm:$0xff]  ;;  %921 = vst [vmem:[%s3664_s1 + $0xdc8] sm:$0xff] %v920_v57  ;;  %v926_v60 = vld [vmem:[%s3663_s0 + $0xde0] sm:$0xff] }
  0xdf   :  { %923 = vst [vmem:[%s3664_s1 + $0xdd0] sm:$0xff] %v922_v58  ;;  %925 = vst [vmem:[%s3664_s1 + $0xdd8] sm:$0xff] %v924_v59  ;;  %v928_v61 = vld [vmem:[%s3663_s0 + $0xde8] sm:$0xff]  ;;  %v930_v62 = vld [vmem:[%s3663_s0 + $0xdf0] sm:$0xff] }
  0xe0   :  { %927 = vst [vmem:[%s3664_s1 + $0xde0] sm:$0xff] %v926_v60  ;;  %929 = vst [vmem:[%s3664_s1 + $0xde8] sm:$0xff] %v928_v61  ;;  %v932_v63 = vld [vmem:[%s3663_s0 + $0xdf8] sm:$0xff] }
  0xe1   :  { %931 = vst [vmem:[%s3664_s1 + $0xdf0] sm:$0xff] %v930_v62  ;;  %933 = vst [vmem:[%s3664_s1 + $0xdf8] sm:$0xff] %v932_v63 }
  0xe2   :  { %941 = vsyncadd [#allocation2], 57344 }
  0xe3   :  { %963 = dma.done.wait [#allocation2], 57344 }
  0xe4   :  { %964 = vsyncadd [#allocation2], 4294909952 }
  0xe5   :  { %948 = vsyncmov [#allocation2] }
  0xe8   :  { %s949_s29 = vpop.sfrf %948 }
  0xe9   :  { %p962_p0 = scmp.ne.s32.totalorder %s949_s29, 0 }
  0xeb   :  { %953 = shalt.err (%p962_p0)  }

</bundles_post_ra>
